<compile_context>
chip_gen: v7x
topology: tpu7x:2x2x1
jax: 0.10.0
libtpu: 0.0.40
codegen_flags: <defaults>
</compile_context>

<pallas_src>
import math
import jax
import jax.numpy as jnp
from jax.experimental import pallas as pl
from jax.experimental.pallas import tpu as pltpu

# --- small hyper-params consistent with the module structure ---
D_MODEL    = 32
NUM_HEAD   = 4
D_HEAD     = D_MODEL // NUM_HEAD      # 8
SEQ_LEN    = D_HEAD                   # must equal d_head for `v @ score` to work
FFN_HIDDEN = 64
VOCAB      = 100
MAX_LEN    = 16
NUM_LAYER  = 2
BATCH      = 2
EPS        = 1e-12

# rows of the packed per-layer "small vector" tile (one (8,128) VMEM tile/layer)
_ROW_BQKV, _ROW_BC, _ROW_B1, _ROW_B2, _ROW_G1, _ROW_BE1, _ROW_G2, _ROW_BE2 = range(8)


def _layer_norm(x, gamma, beta):
    mean = jnp.mean(x, axis=-1, keepdims=True)
    var = jnp.mean((x - mean) ** 2, axis=-1, keepdims=True)   # unbiased=False
    # (x - mean) / sqrt(var + eps)  -> rsqrt goes to the EUP slot (free-ish)
    return gamma * ((x - mean) * jax.lax.rsqrt(var + EPS)) + beta


def encoder_kernel(ids_ref, emb_ref, pos_ref, wqkv_ref, wc_ref, w1_ref, w2_ref,
                   vec_ref, o_ref):
    """Fused embedding + NUM_LAYER encoder layers; whole batch in one block."""
    N = BATCH * SEQ_LEN
    D = D_MODEL

    # --- TransformerEmbedding: token lookup as a one-hot MXU matmul (no gather) ---
    ids = ids_ref[...]                                            # (N, 1) int32
    vocab_iota = jax.lax.broadcasted_iota(jnp.int32, (N, VOCAB), 1)
    one_hot = (vocab_iota == ids).astype(jnp.float32)             # (N, V)
    x = jnp.dot(one_hot, emb_ref[...], preferred_element_type=jnp.float32)
    x = x + pos_ref[...]                                          # + positional (pre-tiled); drop_out = id

    scale = 1.0 / math.sqrt(D_HEAD)
    for l in range(NUM_LAYER):                                    # static unroll over layers
        vl = vec_ref[l]                                           # (8, 128) packed small vectors
        b_qkv = vl[_ROW_BQKV:_ROW_BQKV + 1, 0:3 * D]
        b_c   = vl[_ROW_BC:_ROW_BC + 1,     0:D]
        b_1   = vl[_ROW_B1:_ROW_B1 + 1,     0:FFN_HIDDEN]
        b_2   = vl[_ROW_B2:_ROW_B2 + 1,     0:D]
        g1    = vl[_ROW_G1:_ROW_G1 + 1,     0:D]
        be1   = vl[_ROW_BE1:_ROW_BE1 + 1,   0:D]
        g2    = vl[_ROW_G2:_ROW_G2 + 1,     0:D]
        be2   = vl[_ROW_BE2:_ROW_BE2 + 1,   0:D]

        # ---- multi-head self-attention (single fused QKV projection) ----
        qkv = jnp.dot(x, wqkv_ref[l], preferred_element_type=jnp.float32) + b_qkv
        q = qkv[:, 0:D].reshape(BATCH, SEQ_LEN, D)
        k = qkv[:, D:2 * D].reshape(BATCH, SEQ_LEN, D)
        v = qkv[:, 2 * D:3 * D].reshape(BATCH, SEQ_LEN, D)

        heads = []
        for h in range(NUM_HEAD):                                 # static unroll over heads
            sl = slice(h * D_HEAD, (h + 1) * D_HEAD)
            qh, kh, vh = q[..., sl], k[..., sl], v[..., sl]       # (B, L, dh), batched over B
            s = jnp.einsum('bid,bjd->bij', qh, kh,
                           preferred_element_type=jnp.float32) * scale
            s = s - jnp.max(s, axis=-1, keepdims=True)            # stable softmax (equivalent)
            e = jnp.exp(s)
            p = e * pl.reciprocal(jnp.sum(e, axis=-1, keepdims=True), approx=True)
            # reference quirk: `v @ score` (works because SEQ_LEN == D_HEAD) — reproduced
            heads.append(jnp.einsum('bik,bkj->bij', vh, p,
                                    preferred_element_type=jnp.float32))
        attn = jnp.concatenate(heads, axis=-1).reshape(N, D)      # concat heads -> (N, D)
        attn = jnp.dot(attn, wc_ref[l], preferred_element_type=jnp.float32) + b_c

        # dropout1 = identity ; residual + norm1
        h1 = _layer_norm(attn + x, g1, be1)

        # ---- position-wise feed-forward ----
        f = jnp.dot(h1, w1_ref[l], preferred_element_type=jnp.float32) + b_1
        f = jnp.maximum(f, 0.0)                                   # ReLU (dropout = identity)
        f = jnp.dot(f, w2_ref[l], preferred_element_type=jnp.float32) + b_2

        # dropout2 = identity ; residual + norm2
        x = _layer_norm(f + h1, g2, be2)

    o_ref[...] = x


def encoder_forward(ids, src_mask, params):
    assert src_mask is None, "only src_mask=None is supported (see notes above)"
    B, L = ids.shape
    assert (B, L) == (BATCH, SEQ_LEN), (B, L)
    N = B * L
    ids_col = ids.reshape(N, 1).astype(jnp.int32)
    # positional encoding pre-broadcast to (N, D) on the host side (tiny, done once;
    # keeps the kernel free of in-kernel broadcasts which JAX does not CSE)
    pos = jnp.tile(params["pos_enc"][:L], (B, 1))                 # (N, D)

    vmem = pl.BlockSpec(memory_space=pltpu.MemorySpace.VMEM)
    out = pl.pallas_call(
        encoder_kernel,
        out_shape=jax.ShapeDtypeStruct((N, D_MODEL), jnp.float32),
        in_specs=[vmem] * 8,
        out_specs=vmem,
        compiler_params=pltpu.CompilerParams(vmem_limit_bytes=32 << 20),
    )(ids_col, params["emb"], pos, params["wqkv"], params["wc"],
      params["w1"], params["w2"], params["vecs"])
    return out.reshape(B, L, D_MODEL)


def positional_encoding(max_len, d_model):
    pos = jnp.arange(max_len, dtype=jnp.float32)[:, None]
    _2i = jnp.arange(0, d_model, 2, dtype=jnp.float32)
    # NOTE: (2i * d_model) exponent as in the reference (overflows to inf -> 0/1 pattern)
    denom = jnp.power(jnp.float32(10000.0), _2i * jnp.float32(d_model))
    enc = jnp.zeros((max_len, d_model), jnp.float32)
    enc = enc.at[:, 0::2].set(jnp.sin(pos / denom))
    enc = enc.at[:, 1::2].set(jnp.cos(pos / denom))
    return enc


def init_params(key):
    keys = iter(jax.random.split(key, 64))

    def rnd(shape, scale=0.05):
        return scale * jax.random.normal(next(keys), shape, jnp.float32)

    emb = 0.02 * jax.random.normal(next(keys), (VOCAB, D_MODEL), jnp.float32)
    emb = emb.at[1].set(0.0)                                      # padding_idx=1

    wqkv, wc, w1, w2, vecs = [], [], [], [], []
    for _ in range(NUM_LAYER):
        wq, bq = rnd((D_MODEL, D_MODEL)), rnd((D_MODEL,))
        wk, bk = rnd((D_MODEL, D_MODEL)), rnd((D_MODEL,))
        wv, bv = rnd((D_MODEL, D_MODEL)), rnd((D_MODEL,))
        wc_l, bc = rnd((D_MODEL, D_MODEL)), rnd((D_MODEL,))
        w1_l, b1 = rnd((D_MODEL, FFN_HIDDEN)), rnd((FFN_HIDDEN,))
        w2_l, b2 = rnd((FFN_HIDDEN, D_MODEL)), rnd((D_MODEL,))

        wqkv.append(jnp.concatenate([wq, wk, wv], axis=1))        # fused QKV: (D, 3D)
        wc.append(wc_l); w1.append(w1_l); w2.append(w2_l)

        v = jnp.zeros((8, 128), jnp.float32)                      # one (8,128) tile per layer
        v = v.at[_ROW_BQKV, :3 * D_MODEL].set(jnp.concatenate([bq, bk, bv]))
        v = v.at[_ROW_BC, :D_MODEL].set(bc)
        v = v.at[_ROW_B1, :FFN_HIDDEN].set(b1)
        v = v.at[_ROW_B2, :D_MODEL].set(b2)
        v = v.at[_ROW_G1, :D_MODEL].set(jnp.ones((D_MODEL,), jnp.float32))    # gamma1
        v = v.at[_ROW_BE1, :D_MODEL].set(jnp.zeros((D_MODEL,), jnp.float32))  # beta1
        v = v.at[_ROW_G2, :D_MODEL].set(jnp.ones((D_MODEL,), jnp.float32))    # gamma2
        v = v.at[_ROW_BE2, :D_MODEL].set(jnp.zeros((D_MODEL,), jnp.float32))  # beta2
        vecs.append(v)

    return dict(
        emb=emb,
        pos_enc=positional_encoding(MAX_LEN, D_MODEL),
        wqkv=jnp.stack(wqkv), wc=jnp.stack(wc),
        w1=jnp.stack(w1), w2=jnp.stack(w2), vecs=jnp.stack(vecs),
    )


def encoder_reference(ids, params):
    """Pure-JAX reference mirroring the PyTorch module path (for verification)."""
    B, L = ids.shape
    x = params["emb"][ids] + params["pos_enc"][:L][None]
    for l in range(NUM_LAYER):
        wqkv, wc = params["wqkv"][l], params["wc"][l]
        w1, w2, vl = params["w1"][l], params["w2"][l], params["vecs"][l]
        b_qkv = vl[_ROW_BQKV, :3 * D_MODEL]; b_c = vl[_ROW_BC, :D_MODEL]
        b_1 = vl[_ROW_B1, :FFN_HIDDEN];      b_2 = vl[_ROW_B2, :D_MODEL]
        g1 = vl[_ROW_G1, :D_MODEL];  be1 = vl[_ROW_BE1, :D_MODEL]
        g2 = vl[_ROW_G2, :D_MODEL];  be2 = vl[_ROW_BE2, :D_MODEL]

        qkv = x @ wqkv + b_qkv
        q, k, v = (qkv[..., :D_MODEL], qkv[..., D_MODEL:2 * D_MODEL],
                   qkv[..., 2 * D_MODEL:])

        def split(t):
            return t.reshape(B, L, NUM_HEAD, D_HEAD).transpose(0, 2, 1, 3)

        qh, kh, vh = split(q), split(k), split(v)
        score = qh @ kh.transpose(0, 1, 3, 2) / math.sqrt(D_HEAD)
        score = jax.nn.softmax(score, axis=-1)
        o = vh @ score                                            # reference bug: v @ score
        o = o.transpose(0, 2, 1, 3).reshape(B, L, D_MODEL)
        attn = o @ wc + b_c

        def ln(t, g, b):
            m = t.mean(-1, keepdims=True)
            var = ((t - m) ** 2).mean(-1, keepdims=True)
            return g * (t - m) / jnp.sqrt(var + EPS) + b

        h1 = ln(attn + x, g1, be1)
        f = jnp.maximum(h1 @ w1 + b_1, 0.0) @ w2 + b_2
        x = ln(f + h1, g2, be2)
    return x


if __name__ == "__main__":
    key = jax.random.PRNGKey(0)
    k_ids, k_params = jax.random.split(key)
    ids = jax.random.randint(k_ids, (BATCH, SEQ_LEN), 0, VOCAB, dtype=jnp.int32)
    params = init_params(k_params)

    fwd = jax.jit(lambda i, p: encoder_forward(i, None, p))
    out = jax.block_until_ready(fwd(ids, params))

    assert out.shape == (BATCH, SEQ_LEN, D_MODEL), out.shape
    assert bool(jnp.all(jnp.isfinite(out)))

    ref = encoder_reference(ids, params)
    max_err = float(jnp.max(jnp.abs(out - ref)))
    assert bool(jnp.allclose(out, ref, rtol=5e-3, atol=5e-3)), max_err
    print("KERNEL_OK")
</pallas_src>

<mosaic_0001>
module attributes {stable_mosaic.version = 11 : i64} {
  func.func @encoder_kernel(%arg0: memref<16x1xi32, #tpu.memory_space<vmem>>, %arg1: memref<100x32xf32, #tpu.memory_space<vmem>>, %arg2: memref<16x32xf32, #tpu.memory_space<vmem>>, %arg3: memref<2x32x96xf32, #tpu.memory_space<vmem>>, %arg4: memref<2x32x32xf32, #tpu.memory_space<vmem>>, %arg5: memref<2x32x64xf32, #tpu.memory_space<vmem>>, %arg6: memref<2x64x32xf32, #tpu.memory_space<vmem>>, %arg7: memref<2x8x128xf32, #tpu.memory_space<vmem>>, %arg8: memref<16x32xf32, #tpu.memory_space<vmem>>) attributes {dimension_semantics = [], scalar_prefetch = 0 : i64, scratch_operands = 0 : i64, tpu.core_type = #tpu.core_type<tc>} {
    %c0 = arith.constant 0 : index
    %c0_0 = arith.constant 0 : index
    %0 = vector.load %arg0[%c0, %c0_0] : memref<16x1xi32, #tpu.memory_space<vmem>>, vector<16x1xi32>
    %1 = tpu.iota {dimensions = array<i32: 1>} : vector<16x100xi32>
    %2 = vector.broadcast %0 : vector<16x1xi32> to vector<16x100xi32>
    %3 = arith.cmpi eq, %1, %2 : vector<16x100xi32>
    %4 = arith.extui %3 : vector<16x100xi1> to vector<16x100xi32>
    %5 = arith.sitofp %4 : vector<16x100xi32> to vector<16x100xf32>
    %c0_1 = arith.constant 0 : index
    %c0_2 = arith.constant 0 : index
    %6 = vector.load %arg1[%c0_1, %c0_2] : memref<100x32xf32, #tpu.memory_space<vmem>>, vector<100x32xf32>
    %cst = arith.constant dense<0.000000e+00> : vector<16x32xf32>
    %7 = tpu.matmul %5, %6, %cst {dimension_numbers = #tpu.dot_dimension_numbers<[1], [0], [0], [1], [0, 0, 1, 1], [], []>} : vector<16x100xf32>, vector<100x32xf32>, vector<16x32xf32> -> vector<16x32xf32>
    %c0_3 = arith.constant 0 : index
    %c0_4 = arith.constant 0 : index
    %8 = vector.load %arg2[%c0_3, %c0_4] : memref<16x32xf32, #tpu.memory_space<vmem>>, vector<16x32xf32>
    %9 = arith.addf %7, %8 : vector<16x32xf32>
    %c0_5 = arith.constant 0 : index
    %c0_6 = arith.constant 0 : index
    %c0_7 = arith.constant 0 : index
    %10 = vector.load %arg7[%c0_5, %c0_6, %c0_7] : memref<2x8x128xf32, #tpu.memory_space<vmem>>, vector<1x8x128xf32>
    %11 = vector.shape_cast %10 : vector<1x8x128xf32> to vector<8x128xf32>
    %12 = vector.extract_strided_slice %11 {offsets = [0, 0], sizes = [1, 96], strides = [1, 1]} : vector<8x128xf32> to vector<1x96xf32>
    %13 = vector.extract_strided_slice %11 {offsets = [1, 0], sizes = [1, 32], strides = [1, 1]} : vector<8x128xf32> to vector<1x32xf32>
    %14 = vector.extract_strided_slice %11 {offsets = [2, 0], sizes = [1, 64], strides = [1, 1]} : vector<8x128xf32> to vector<1x64xf32>
    %15 = vector.extract_strided_slice %11 {offsets = [3, 0], sizes = [1, 32], strides = [1, 1]} : vector<8x128xf32> to vector<1x32xf32>
    %16 = vector.extract_strided_slice %11 {offsets = [4, 0], sizes = [1, 32], strides = [1, 1]} : vector<8x128xf32> to vector<1x32xf32>
    %17 = vector.extract_strided_slice %11 {offsets = [5, 0], sizes = [1, 32], strides = [1, 1]} : vector<8x128xf32> to vector<1x32xf32>
    %18 = vector.extract_strided_slice %11 {offsets = [6, 0], sizes = [1, 32], strides = [1, 1]} : vector<8x128xf32> to vector<1x32xf32>
    %19 = vector.extract_strided_slice %11 {offsets = [7, 0], sizes = [1, 32], strides = [1, 1]} : vector<8x128xf32> to vector<1x32xf32>
    %c0_8 = arith.constant 0 : index
    %c0_9 = arith.constant 0 : index
    %c0_10 = arith.constant 0 : index
    %20 = vector.load %arg3[%c0_8, %c0_9, %c0_10] : memref<2x32x96xf32, #tpu.memory_space<vmem>>, vector<1x32x96xf32>
    %21 = vector.shape_cast %20 : vector<1x32x96xf32> to vector<32x96xf32>
    %cst_11 = arith.constant dense<0.000000e+00> : vector<16x96xf32>
    %22 = tpu.matmul %9, %21, %cst_11 {dimension_numbers = #tpu.dot_dimension_numbers<[1], [0], [0], [1], [0, 0, 1, 1], [], []>} : vector<16x32xf32>, vector<32x96xf32>, vector<16x96xf32> -> vector<16x96xf32>
    %23 = vector.broadcast %12 : vector<1x96xf32> to vector<16x96xf32>
    %24 = arith.addf %22, %23 : vector<16x96xf32>
    %25 = vector.extract_strided_slice %24 {offsets = [0, 0], sizes = [16, 32], strides = [1, 1]} : vector<16x96xf32> to vector<16x32xf32>
    %26 = vector.shape_cast %25 : vector<16x32xf32> to vector<2x8x32xf32>
    %27 = vector.extract_strided_slice %24 {offsets = [0, 32], sizes = [16, 32], strides = [1, 1]} : vector<16x96xf32> to vector<16x32xf32>
    %28 = vector.shape_cast %27 : vector<16x32xf32> to vector<2x8x32xf32>
    %29 = vector.extract_strided_slice %24 {offsets = [0, 64], sizes = [16, 32], strides = [1, 1]} : vector<16x96xf32> to vector<16x32xf32>
    %30 = vector.shape_cast %29 : vector<16x32xf32> to vector<2x8x32xf32>
    %31 = vector.extract_strided_slice %26 {offsets = [0, 0, 0], sizes = [2, 8, 8], strides = [1, 1, 1]} : vector<2x8x32xf32> to vector<2x8x8xf32>
    %32 = vector.extract_strided_slice %28 {offsets = [0, 0, 0], sizes = [2, 8, 8], strides = [1, 1, 1]} : vector<2x8x32xf32> to vector<2x8x8xf32>
    %33 = vector.extract_strided_slice %30 {offsets = [0, 0, 0], sizes = [2, 8, 8], strides = [1, 1, 1]} : vector<2x8x32xf32> to vector<2x8x8xf32>
    "tpu.trace_start"() <{level = 10 : i32, message = "bid,bjd->bij"}> : () -> ()
    %cst_12 = arith.constant dense<0.000000e+00> : vector<2x8x8xf32>
    %34 = tpu.matmul %31, %32, %cst_12 {dimension_numbers = #tpu.dot_dimension_numbers<[2], [2], [1], [1], [0, 0, 0, 1, 1, 1], [0], [0]>} : vector<2x8x8xf32>, vector<2x8x8xf32>, vector<2x8x8xf32> -> vector<2x8x8xf32>
    "tpu.trace_stop"() : () -> ()
    %cst_13 = arith.constant 0.353553385 : f32
    %35 = vector.broadcast %cst_13 : f32 to vector<2x8x8xf32>
    %36 = arith.mulf %34, %35 : vector<2x8x8xf32>
    %cst_14 = arith.constant dense<0xFF800000> : vector<2x8xf32>
    %37 = vector.multi_reduction <maximumf>, %36, %cst_14 [2] : vector<2x8x8xf32> to vector<2x8xf32>
    %38 = vector.shape_cast %37 : vector<2x8xf32> to vector<2x8x1xf32>
    %39 = vector.broadcast %38 : vector<2x8x1xf32> to vector<2x8x8xf32>
    %40 = arith.subf %36, %39 : vector<2x8x8xf32>
    %41 = math.exp %40 : vector<2x8x8xf32>
    %cst_15 = arith.constant dense<0.000000e+00> : vector<2x8xf32>
    %42 = vector.multi_reduction <add>, %41, %cst_15 [2] : vector<2x8x8xf32> to vector<2x8xf32>
    %43 = vector.shape_cast %42 : vector<2x8xf32> to vector<2x8x1xf32>
    %44 = tpu.reciprocal %43 {approx = true} : vector<2x8x1xf32> -> vector<2x8x1xf32>
    %45 = vector.broadcast %44 : vector<2x8x1xf32> to vector<2x8x8xf32>
    %46 = arith.mulf %41, %45 : vector<2x8x8xf32>
    "tpu.trace_start"() <{level = 10 : i32, message = "bik,bkj->bij"}> : () -> ()
    %cst_16 = arith.constant dense<0.000000e+00> : vector<2x8x8xf32>
    %47 = tpu.matmul %33, %46, %cst_16 {dimension_numbers = #tpu.dot_dimension_numbers<[2], [1], [1], [2], [0, 0, 0, 1, 1, 2], [0], [0]>} : vector<2x8x8xf32>, vector<2x8x8xf32>, vector<2x8x8xf32> -> vector<2x8x8xf32>
    "tpu.trace_stop"() : () -> ()
    %48 = vector.extract_strided_slice %26 {offsets = [0, 0, 8], sizes = [2, 8, 8], strides = [1, 1, 1]} : vector<2x8x32xf32> to vector<2x8x8xf32>
    %49 = vector.extract_strided_slice %28 {offsets = [0, 0, 8], sizes = [2, 8, 8], strides = [1, 1, 1]} : vector<2x8x32xf32> to vector<2x8x8xf32>
    %50 = vector.extract_strided_slice %30 {offsets = [0, 0, 8], sizes = [2, 8, 8], strides = [1, 1, 1]} : vector<2x8x32xf32> to vector<2x8x8xf32>
    "tpu.trace_start"() <{level = 10 : i32, message = "bid,bjd->bij"}> : () -> ()
    %cst_17 = arith.constant dense<0.000000e+00> : vector<2x8x8xf32>
    %51 = tpu.matmul %48, %49, %cst_17 {dimension_numbers = #tpu.dot_dimension_numbers<[2], [2], [1], [1], [0, 0, 0, 1, 1, 1], [0], [0]>} : vector<2x8x8xf32>, vector<2x8x8xf32>, vector<2x8x8xf32> -> vector<2x8x8xf32>
    "tpu.trace_stop"() : () -> ()
    %cst_18 = arith.constant 0.353553385 : f32
    %52 = vector.broadcast %cst_18 : f32 to vector<2x8x8xf32>
    %53 = arith.mulf %51, %52 : vector<2x8x8xf32>
    %cst_19 = arith.constant dense<0xFF800000> : vector<2x8xf32>
    %54 = vector.multi_reduction <maximumf>, %53, %cst_19 [2] : vector<2x8x8xf32> to vector<2x8xf32>
    %55 = vector.shape_cast %54 : vector<2x8xf32> to vector<2x8x1xf32>
    %56 = vector.broadcast %55 : vector<2x8x1xf32> to vector<2x8x8xf32>
    %57 = arith.subf %53, %56 : vector<2x8x8xf32>
    %58 = math.exp %57 : vector<2x8x8xf32>
    %cst_20 = arith.constant dense<0.000000e+00> : vector<2x8xf32>
    %59 = vector.multi_reduction <add>, %58, %cst_20 [2] : vector<2x8x8xf32> to vector<2x8xf32>
    %60 = vector.shape_cast %59 : vector<2x8xf32> to vector<2x8x1xf32>
    %61 = tpu.reciprocal %60 {approx = true} : vector<2x8x1xf32> -> vector<2x8x1xf32>
    %62 = vector.broadcast %61 : vector<2x8x1xf32> to vector<2x8x8xf32>
    %63 = arith.mulf %58, %62 : vector<2x8x8xf32>
    "tpu.trace_start"() <{level = 10 : i32, message = "bik,bkj->bij"}> : () -> ()
    %cst_21 = arith.constant dense<0.000000e+00> : vector<2x8x8xf32>
    %64 = tpu.matmul %50, %63, %cst_21 {dimension_numbers = #tpu.dot_dimension_numbers<[2], [1], [1], [2], [0, 0, 0, 1, 1, 2], [0], [0]>} : vector<2x8x8xf32>, vector<2x8x8xf32>, vector<2x8x8xf32> -> vector<2x8x8xf32>
    "tpu.trace_stop"() : () -> ()
    %65 = vector.extract_strided_slice %26 {offsets = [0, 0, 16], sizes = [2, 8, 8], strides = [1, 1, 1]} : vector<2x8x32xf32> to vector<2x8x8xf32>
    %66 = vector.extract_strided_slice %28 {offsets = [0, 0, 16], sizes = [2, 8, 8], strides = [1, 1, 1]} : vector<2x8x32xf32> to vector<2x8x8xf32>
    %67 = vector.extract_strided_slice %30 {offsets = [0, 0, 16], sizes = [2, 8, 8], strides = [1, 1, 1]} : vector<2x8x32xf32> to vector<2x8x8xf32>
    "tpu.trace_start"() <{level = 10 : i32, message = "bid,bjd->bij"}> : () -> ()
    %cst_22 = arith.constant dense<0.000000e+00> : vector<2x8x8xf32>
    %68 = tpu.matmul %65, %66, %cst_22 {dimension_numbers = #tpu.dot_dimension_numbers<[2], [2], [1], [1], [0, 0, 0, 1, 1, 1], [0], [0]>} : vector<2x8x8xf32>, vector<2x8x8xf32>, vector<2x8x8xf32> -> vector<2x8x8xf32>
    "tpu.trace_stop"() : () -> ()
    %cst_23 = arith.constant 0.353553385 : f32
    %69 = vector.broadcast %cst_23 : f32 to vector<2x8x8xf32>
    %70 = arith.mulf %68, %69 : vector<2x8x8xf32>
    %cst_24 = arith.constant dense<0xFF800000> : vector<2x8xf32>
    %71 = vector.multi_reduction <maximumf>, %70, %cst_24 [2] : vector<2x8x8xf32> to vector<2x8xf32>
    %72 = vector.shape_cast %71 : vector<2x8xf32> to vector<2x8x1xf32>
    %73 = vector.broadcast %72 : vector<2x8x1xf32> to vector<2x8x8xf32>
    %74 = arith.subf %70, %73 : vector<2x8x8xf32>
    %75 = math.exp %74 : vector<2x8x8xf32>
    %cst_25 = arith.constant dense<0.000000e+00> : vector<2x8xf32>
    %76 = vector.multi_reduction <add>, %75, %cst_25 [2] : vector<2x8x8xf32> to vector<2x8xf32>
    %77 = vector.shape_cast %76 : vector<2x8xf32> to vector<2x8x1xf32>
    %78 = tpu.reciprocal %77 {approx = true} : vector<2x8x1xf32> -> vector<2x8x1xf32>
    %79 = vector.broadcast %78 : vector<2x8x1xf32> to vector<2x8x8xf32>
    %80 = arith.mulf %75, %79 : vector<2x8x8xf32>
    "tpu.trace_start"() <{level = 10 : i32, message = "bik,bkj->bij"}> : () -> ()
    %cst_26 = arith.constant dense<0.000000e+00> : vector<2x8x8xf32>
    %81 = tpu.matmul %67, %80, %cst_26 {dimension_numbers = #tpu.dot_dimension_numbers<[2], [1], [1], [2], [0, 0, 0, 1, 1, 2], [0], [0]>} : vector<2x8x8xf32>, vector<2x8x8xf32>, vector<2x8x8xf32> -> vector<2x8x8xf32>
    "tpu.trace_stop"() : () -> ()
    %82 = vector.extract_strided_slice %26 {offsets = [0, 0, 24], sizes = [2, 8, 8], strides = [1, 1, 1]} : vector<2x8x32xf32> to vector<2x8x8xf32>
    %83 = vector.extract_strided_slice %28 {offsets = [0, 0, 24], sizes = [2, 8, 8], strides = [1, 1, 1]} : vector<2x8x32xf32> to vector<2x8x8xf32>
    %84 = vector.extract_strided_slice %30 {offsets = [0, 0, 24], sizes = [2, 8, 8], strides = [1, 1, 1]} : vector<2x8x32xf32> to vector<2x8x8xf32>
    "tpu.trace_start"() <{level = 10 : i32, message = "bid,bjd->bij"}> : () -> ()
    %cst_27 = arith.constant dense<0.000000e+00> : vector<2x8x8xf32>
    %85 = tpu.matmul %82, %83, %cst_27 {dimension_numbers = #tpu.dot_dimension_numbers<[2], [2], [1], [1], [0, 0, 0, 1, 1, 1], [0], [0]>} : vector<2x8x8xf32>, vector<2x8x8xf32>, vector<2x8x8xf32> -> vector<2x8x8xf32>
    "tpu.trace_stop"() : () -> ()
    %cst_28 = arith.constant 0.353553385 : f32
    %86 = vector.broadcast %cst_28 : f32 to vector<2x8x8xf32>
    %87 = arith.mulf %85, %86 : vector<2x8x8xf32>
    %cst_29 = arith.constant dense<0xFF800000> : vector<2x8xf32>
    %88 = vector.multi_reduction <maximumf>, %87, %cst_29 [2] : vector<2x8x8xf32> to vector<2x8xf32>
    %89 = vector.shape_cast %88 : vector<2x8xf32> to vector<2x8x1xf32>
    %90 = vector.broadcast %89 : vector<2x8x1xf32> to vector<2x8x8xf32>
    %91 = arith.subf %87, %90 : vector<2x8x8xf32>
    %92 = math.exp %91 : vector<2x8x8xf32>
    %cst_30 = arith.constant dense<0.000000e+00> : vector<2x8xf32>
    %93 = vector.multi_reduction <add>, %92, %cst_30 [2] : vector<2x8x8xf32> to vector<2x8xf32>
    %94 = vector.shape_cast %93 : vector<2x8xf32> to vector<2x8x1xf32>
    %95 = tpu.reciprocal %94 {approx = true} : vector<2x8x1xf32> -> vector<2x8x1xf32>
    %96 = vector.broadcast %95 : vector<2x8x1xf32> to vector<2x8x8xf32>
    %97 = arith.mulf %92, %96 : vector<2x8x8xf32>
    "tpu.trace_start"() <{level = 10 : i32, message = "bik,bkj->bij"}> : () -> ()
    %cst_31 = arith.constant dense<0.000000e+00> : vector<2x8x8xf32>
    %98 = tpu.matmul %84, %97, %cst_31 {dimension_numbers = #tpu.dot_dimension_numbers<[2], [1], [1], [2], [0, 0, 0, 1, 1, 2], [0], [0]>} : vector<2x8x8xf32>, vector<2x8x8xf32>, vector<2x8x8xf32> -> vector<2x8x8xf32>
    "tpu.trace_stop"() : () -> ()
    %99 = tpu.concatenate %47, %64, %81, %98 in 2 : vector<2x8x8xf32>, vector<2x8x8xf32>, vector<2x8x8xf32>, vector<2x8x8xf32> -> vector<2x8x32xf32>
    %100 = vector.shape_cast %99 : vector<2x8x32xf32> to vector<16x32xf32>
    %c0_32 = arith.constant 0 : index
    %c0_33 = arith.constant 0 : index
    %c0_34 = arith.constant 0 : index
    %101 = vector.load %arg4[%c0_32, %c0_33, %c0_34] : memref<2x32x32xf32, #tpu.memory_space<vmem>>, vector<1x32x32xf32>
    %102 = vector.shape_cast %101 : vector<1x32x32xf32> to vector<32x32xf32>
    %cst_35 = arith.constant dense<0.000000e+00> : vector<16x32xf32>
    %103 = tpu.matmul %100, %102, %cst_35 {dimension_numbers = #tpu.dot_dimension_numbers<[1], [0], [0], [1], [0, 0, 1, 1], [], []>} : vector<16x32xf32>, vector<32x32xf32>, vector<16x32xf32> -> vector<16x32xf32>
    %104 = vector.broadcast %13 : vector<1x32xf32> to vector<16x32xf32>
    %105 = arith.addf %103, %104 : vector<16x32xf32>
    %106 = arith.addf %105, %9 : vector<16x32xf32>
    %cst_36 = arith.constant dense<0.000000e+00> : vector<16xf32>
    %107 = vector.multi_reduction <add>, %106, %cst_36 [1] : vector<16x32xf32> to vector<16xf32>
    %108 = vector.shape_cast %107 : vector<16xf32> to vector<16x1xf32>
    %cst_37 = arith.constant 3.200000e+01 : f32
    %109 = vector.broadcast %cst_37 : f32 to vector<16x1xf32>
    %110 = arith.divf %108, %109 : vector<16x1xf32>
    %111 = vector.broadcast %110 : vector<16x1xf32> to vector<16x32xf32>
    %112 = arith.subf %106, %111 : vector<16x32xf32>
    %113 = arith.mulf %112, %112 : vector<16x32xf32>
    %cst_38 = arith.constant dense<0.000000e+00> : vector<16xf32>
    %114 = vector.multi_reduction <add>, %113, %cst_38 [1] : vector<16x32xf32> to vector<16xf32>
    %115 = vector.shape_cast %114 : vector<16xf32> to vector<16x1xf32>
    %cst_39 = arith.constant 3.200000e+01 : f32
    %116 = vector.broadcast %cst_39 : f32 to vector<16x1xf32>
    %117 = arith.divf %115, %116 : vector<16x1xf32>
    %118 = vector.broadcast %110 : vector<16x1xf32> to vector<16x32xf32>
    %119 = arith.subf %106, %118 : vector<16x32xf32>
    %cst_40 = arith.constant 9.99999996E-13 : f32
    %120 = vector.broadcast %cst_40 : f32 to vector<16x1xf32>
    %121 = arith.addf %117, %120 : vector<16x1xf32>
    %122 = math.rsqrt %121 : vector<16x1xf32>
    %123 = vector.broadcast %122 : vector<16x1xf32> to vector<16x32xf32>
    %124 = arith.mulf %119, %123 : vector<16x32xf32>
    %125 = vector.broadcast %16 : vector<1x32xf32> to vector<16x32xf32>
    %126 = arith.mulf %125, %124 : vector<16x32xf32>
    %127 = vector.broadcast %17 : vector<1x32xf32> to vector<16x32xf32>
    %128 = arith.addf %126, %127 : vector<16x32xf32>
    %c0_41 = arith.constant 0 : index
    %c0_42 = arith.constant 0 : index
    %c0_43 = arith.constant 0 : index
    %129 = vector.load %arg5[%c0_41, %c0_42, %c0_43] : memref<2x32x64xf32, #tpu.memory_space<vmem>>, vector<1x32x64xf32>
    %130 = vector.shape_cast %129 : vector<1x32x64xf32> to vector<32x64xf32>
    %cst_44 = arith.constant dense<0.000000e+00> : vector<16x64xf32>
    %131 = tpu.matmul %128, %130, %cst_44 {dimension_numbers = #tpu.dot_dimension_numbers<[1], [0], [0], [1], [0, 0, 1, 1], [], []>} : vector<16x32xf32>, vector<32x64xf32>, vector<16x64xf32> -> vector<16x64xf32>
    %132 = vector.broadcast %14 : vector<1x64xf32> to vector<16x64xf32>
    %133 = arith.addf %131, %132 : vector<16x64xf32>
    %cst_45 = arith.constant 0.000000e+00 : f32
    %134 = vector.broadcast %cst_45 : f32 to vector<16x64xf32>
    %135 = arith.maximumf %133, %134 : vector<16x64xf32>
    %c0_46 = arith.constant 0 : index
    %c0_47 = arith.constant 0 : index
    %c0_48 = arith.constant 0 : index
    %136 = vector.load %arg6[%c0_46, %c0_47, %c0_48] : memref<2x64x32xf32, #tpu.memory_space<vmem>>, vector<1x64x32xf32>
    %137 = vector.shape_cast %136 : vector<1x64x32xf32> to vector<64x32xf32>
    %cst_49 = arith.constant dense<0.000000e+00> : vector<16x32xf32>
    %138 = tpu.matmul %135, %137, %cst_49 {dimension_numbers = #tpu.dot_dimension_numbers<[1], [0], [0], [1], [0, 0, 1, 1], [], []>} : vector<16x64xf32>, vector<64x32xf32>, vector<16x32xf32> -> vector<16x32xf32>
    %139 = vector.broadcast %15 : vector<1x32xf32> to vector<16x32xf32>
    %140 = arith.addf %138, %139 : vector<16x32xf32>
    %141 = arith.addf %140, %128 : vector<16x32xf32>
    %cst_50 = arith.constant dense<0.000000e+00> : vector<16xf32>
    %142 = vector.multi_reduction <add>, %141, %cst_50 [1] : vector<16x32xf32> to vector<16xf32>
    %143 = vector.shape_cast %142 : vector<16xf32> to vector<16x1xf32>
    %cst_51 = arith.constant 3.200000e+01 : f32
    %144 = vector.broadcast %cst_51 : f32 to vector<16x1xf32>
    %145 = arith.divf %143, %144 : vector<16x1xf32>
    %146 = vector.broadcast %145 : vector<16x1xf32> to vector<16x32xf32>
    %147 = arith.subf %141, %146 : vector<16x32xf32>
    %148 = arith.mulf %147, %147 : vector<16x32xf32>
    %cst_52 = arith.constant dense<0.000000e+00> : vector<16xf32>
    %149 = vector.multi_reduction <add>, %148, %cst_52 [1] : vector<16x32xf32> to vector<16xf32>
    %150 = vector.shape_cast %149 : vector<16xf32> to vector<16x1xf32>
    %cst_53 = arith.constant 3.200000e+01 : f32
    %151 = vector.broadcast %cst_53 : f32 to vector<16x1xf32>
    %152 = arith.divf %150, %151 : vector<16x1xf32>
    %153 = vector.broadcast %145 : vector<16x1xf32> to vector<16x32xf32>
    %154 = arith.subf %141, %153 : vector<16x32xf32>
    %cst_54 = arith.constant 9.99999996E-13 : f32
    %155 = vector.broadcast %cst_54 : f32 to vector<16x1xf32>
    %156 = arith.addf %152, %155 : vector<16x1xf32>
    %157 = math.rsqrt %156 : vector<16x1xf32>
    %158 = vector.broadcast %157 : vector<16x1xf32> to vector<16x32xf32>
    %159 = arith.mulf %154, %158 : vector<16x32xf32>
    %160 = vector.broadcast %18 : vector<1x32xf32> to vector<16x32xf32>
    %161 = arith.mulf %160, %159 : vector<16x32xf32>
    %162 = vector.broadcast %19 : vector<1x32xf32> to vector<16x32xf32>
    %163 = arith.addf %161, %162 : vector<16x32xf32>
    %c1 = arith.constant 1 : index
    %c0_55 = arith.constant 0 : index
    %c0_56 = arith.constant 0 : index
    %164 = vector.load %arg7[%c1, %c0_55, %c0_56] : memref<2x8x128xf32, #tpu.memory_space<vmem>>, vector<1x8x128xf32>
    %165 = vector.shape_cast %164 : vector<1x8x128xf32> to vector<8x128xf32>
    %166 = vector.extract_strided_slice %165 {offsets = [0, 0], sizes = [1, 96], strides = [1, 1]} : vector<8x128xf32> to vector<1x96xf32>
    %167 = vector.extract_strided_slice %165 {offsets = [1, 0], sizes = [1, 32], strides = [1, 1]} : vector<8x128xf32> to vector<1x32xf32>
    %168 = vector.extract_strided_slice %165 {offsets = [2, 0], sizes = [1, 64], strides = [1, 1]} : vector<8x128xf32> to vector<1x64xf32>
    %169 = vector.extract_strided_slice %165 {offsets = [3, 0], sizes = [1, 32], strides = [1, 1]} : vector<8x128xf32> to vector<1x32xf32>
    %170 = vector.extract_strided_slice %165 {offsets = [4, 0], sizes = [1, 32], strides = [1, 1]} : vector<8x128xf32> to vector<1x32xf32>
    %171 = vector.extract_strided_slice %165 {offsets = [5, 0], sizes = [1, 32], strides = [1, 1]} : vector<8x128xf32> to vector<1x32xf32>
    %172 = vector.extract_strided_slice %165 {offsets = [6, 0], sizes = [1, 32], strides = [1, 1]} : vector<8x128xf32> to vector<1x32xf32>
    %173 = vector.extract_strided_slice %165 {offsets = [7, 0], sizes = [1, 32], strides = [1, 1]} : vector<8x128xf32> to vector<1x32xf32>
    %c1_57 = arith.constant 1 : index
    %c0_58 = arith.constant 0 : index
    %c0_59 = arith.constant 0 : index
    %174 = vector.load %arg3[%c1_57, %c0_58, %c0_59] : memref<2x32x96xf32, #tpu.memory_space<vmem>>, vector<1x32x96xf32>
    %175 = vector.shape_cast %174 : vector<1x32x96xf32> to vector<32x96xf32>
    %cst_60 = arith.constant dense<0.000000e+00> : vector<16x96xf32>
    %176 = tpu.matmul %163, %175, %cst_60 {dimension_numbers = #tpu.dot_dimension_numbers<[1], [0], [0], [1], [0, 0, 1, 1], [], []>} : vector<16x32xf32>, vector<32x96xf32>, vector<16x96xf32> -> vector<16x96xf32>
    %177 = vector.broadcast %166 : vector<1x96xf32> to vector<16x96xf32>
    %178 = arith.addf %176, %177 : vector<16x96xf32>
    %179 = vector.extract_strided_slice %178 {offsets = [0, 0], sizes = [16, 32], strides = [1, 1]} : vector<16x96xf32> to vector<16x32xf32>
    %180 = vector.shape_cast %179 : vector<16x32xf32> to vector<2x8x32xf32>
    %181 = vector.extract_strided_slice %178 {offsets = [0, 32], sizes = [16, 32], strides = [1, 1]} : vector<16x96xf32> to vector<16x32xf32>
    %182 = vector.shape_cast %181 : vector<16x32xf32> to vector<2x8x32xf32>
    %183 = vector.extract_strided_slice %178 {offsets = [0, 64], sizes = [16, 32], strides = [1, 1]} : vector<16x96xf32> to vector<16x32xf32>
    %184 = vector.shape_cast %183 : vector<16x32xf32> to vector<2x8x32xf32>
    %185 = vector.extract_strided_slice %180 {offsets = [0, 0, 0], sizes = [2, 8, 8], strides = [1, 1, 1]} : vector<2x8x32xf32> to vector<2x8x8xf32>
    %186 = vector.extract_strided_slice %182 {offsets = [0, 0, 0], sizes = [2, 8, 8], strides = [1, 1, 1]} : vector<2x8x32xf32> to vector<2x8x8xf32>
    %187 = vector.extract_strided_slice %184 {offsets = [0, 0, 0], sizes = [2, 8, 8], strides = [1, 1, 1]} : vector<2x8x32xf32> to vector<2x8x8xf32>
    "tpu.trace_start"() <{level = 10 : i32, message = "bid,bjd->bij"}> : () -> ()
    %cst_61 = arith.constant dense<0.000000e+00> : vector<2x8x8xf32>
    %188 = tpu.matmul %185, %186, %cst_61 {dimension_numbers = #tpu.dot_dimension_numbers<[2], [2], [1], [1], [0, 0, 0, 1, 1, 1], [0], [0]>} : vector<2x8x8xf32>, vector<2x8x8xf32>, vector<2x8x8xf32> -> vector<2x8x8xf32>
    "tpu.trace_stop"() : () -> ()
    %cst_62 = arith.constant 0.353553385 : f32
    %189 = vector.broadcast %cst_62 : f32 to vector<2x8x8xf32>
    %190 = arith.mulf %188, %189 : vector<2x8x8xf32>
    %cst_63 = arith.constant dense<0xFF800000> : vector<2x8xf32>
    %191 = vector.multi_reduction <maximumf>, %190, %cst_63 [2] : vector<2x8x8xf32> to vector<2x8xf32>
    %192 = vector.shape_cast %191 : vector<2x8xf32> to vector<2x8x1xf32>
    %193 = vector.broadcast %192 : vector<2x8x1xf32> to vector<2x8x8xf32>
    %194 = arith.subf %190, %193 : vector<2x8x8xf32>
    %195 = math.exp %194 : vector<2x8x8xf32>
    %cst_64 = arith.constant dense<0.000000e+00> : vector<2x8xf32>
    %196 = vector.multi_reduction <add>, %195, %cst_64 [2] : vector<2x8x8xf32> to vector<2x8xf32>
    %197 = vector.shape_cast %196 : vector<2x8xf32> to vector<2x8x1xf32>
    %198 = tpu.reciprocal %197 {approx = true} : vector<2x8x1xf32> -> vector<2x8x1xf32>
    %199 = vector.broadcast %198 : vector<2x8x1xf32> to vector<2x8x8xf32>
    %200 = arith.mulf %195, %199 : vector<2x8x8xf32>
    "tpu.trace_start"() <{level = 10 : i32, message = "bik,bkj->bij"}> : () -> ()
    %cst_65 = arith.constant dense<0.000000e+00> : vector<2x8x8xf32>
    %201 = tpu.matmul %187, %200, %cst_65 {dimension_numbers = #tpu.dot_dimension_numbers<[2], [1], [1], [2], [0, 0, 0, 1, 1, 2], [0], [0]>} : vector<2x8x8xf32>, vector<2x8x8xf32>, vector<2x8x8xf32> -> vector<2x8x8xf32>
    "tpu.trace_stop"() : () -> ()
    %202 = vector.extract_strided_slice %180 {offsets = [0, 0, 8], sizes = [2, 8, 8], strides = [1, 1, 1]} : vector<2x8x32xf32> to vector<2x8x8xf32>
    %203 = vector.extract_strided_slice %182 {offsets = [0, 0, 8], sizes = [2, 8, 8], strides = [1, 1, 1]} : vector<2x8x32xf32> to vector<2x8x8xf32>
    %204 = vector.extract_strided_slice %184 {offsets = [0, 0, 8], sizes = [2, 8, 8], strides = [1, 1, 1]} : vector<2x8x32xf32> to vector<2x8x8xf32>
    "tpu.trace_start"() <{level = 10 : i32, message = "bid,bjd->bij"}> : () -> ()
    %cst_66 = arith.constant dense<0.000000e+00> : vector<2x8x8xf32>
    %205 = tpu.matmul %202, %203, %cst_66 {dimension_numbers = #tpu.dot_dimension_numbers<[2], [2], [1], [1], [0, 0, 0, 1, 1, 1], [0], [0]>} : vector<2x8x8xf32>, vector<2x8x8xf32>, vector<2x8x8xf32> -> vector<2x8x8xf32>
    "tpu.trace_stop"() : () -> ()
    %cst_67 = arith.constant 0.353553385 : f32
    %206 = vector.broadcast %cst_67 : f32 to vector<2x8x8xf32>
    %207 = arith.mulf %205, %206 : vector<2x8x8xf32>
    %cst_68 = arith.constant dense<0xFF800000> : vector<2x8xf32>
    %208 = vector.multi_reduction <maximumf>, %207, %cst_68 [2] : vector<2x8x8xf32> to vector<2x8xf32>
    %209 = vector.shape_cast %208 : vector<2x8xf32> to vector<2x8x1xf32>
    %210 = vector.broadcast %209 : vector<2x8x1xf32> to vector<2x8x8xf32>
    %211 = arith.subf %207, %210 : vector<2x8x8xf32>
    %212 = math.exp %211 : vector<2x8x8xf32>
    %cst_69 = arith.constant dense<0.000000e+00> : vector<2x8xf32>
    %213 = vector.multi_reduction <add>, %212, %cst_69 [2] : vector<2x8x8xf32> to vector<2x8xf32>
    %214 = vector.shape_cast %213 : vector<2x8xf32> to vector<2x8x1xf32>
    %215 = tpu.reciprocal %214 {approx = true} : vector<2x8x1xf32> -> vector<2x8x1xf32>
    %216 = vector.broadcast %215 : vector<2x8x1xf32> to vector<2x8x8xf32>
    %217 = arith.mulf %212, %216 : vector<2x8x8xf32>
    "tpu.trace_start"() <{level = 10 : i32, message = "bik,bkj->bij"}> : () -> ()
    %cst_70 = arith.constant dense<0.000000e+00> : vector<2x8x8xf32>
    %218 = tpu.matmul %204, %217, %cst_70 {dimension_numbers = #tpu.dot_dimension_numbers<[2], [1], [1], [2], [0, 0, 0, 1, 1, 2], [0], [0]>} : vector<2x8x8xf32>, vector<2x8x8xf32>, vector<2x8x8xf32> -> vector<2x8x8xf32>
    "tpu.trace_stop"() : () -> ()
    %219 = vector.extract_strided_slice %180 {offsets = [0, 0, 16], sizes = [2, 8, 8], strides = [1, 1, 1]} : vector<2x8x32xf32> to vector<2x8x8xf32>
    %220 = vector.extract_strided_slice %182 {offsets = [0, 0, 16], sizes = [2, 8, 8], strides = [1, 1, 1]} : vector<2x8x32xf32> to vector<2x8x8xf32>
    %221 = vector.extract_strided_slice %184 {offsets = [0, 0, 16], sizes = [2, 8, 8], strides = [1, 1, 1]} : vector<2x8x32xf32> to vector<2x8x8xf32>
    "tpu.trace_start"() <{level = 10 : i32, message = "bid,bjd->bij"}> : () -> ()
    %cst_71 = arith.constant dense<0.000000e+00> : vector<2x8x8xf32>
    %222 = tpu.matmul %219, %220, %cst_71 {dimension_numbers = #tpu.dot_dimension_numbers<[2], [2], [1], [1], [0, 0, 0, 1, 1, 1], [0], [0]>} : vector<2x8x8xf32>, vector<2x8x8xf32>, vector<2x8x8xf32> -> vector<2x8x8xf32>
    "tpu.trace_stop"() : () -> ()
    %cst_72 = arith.constant 0.353553385 : f32
    %223 = vector.broadcast %cst_72 : f32 to vector<2x8x8xf32>
    %224 = arith.mulf %222, %223 : vector<2x8x8xf32>
    %cst_73 = arith.constant dense<0xFF800000> : vector<2x8xf32>
    %225 = vector.multi_reduction <maximumf>, %224, %cst_73 [2] : vector<2x8x8xf32> to vector<2x8xf32>
    %226 = vector.shape_cast %225 : vector<2x8xf32> to vector<2x8x1xf32>
    %227 = vector.broadcast %226 : vector<2x8x1xf32> to vector<2x8x8xf32>
    %228 = arith.subf %224, %227 : vector<2x8x8xf32>
    %229 = math.exp %228 : vector<2x8x8xf32>
    %cst_74 = arith.constant dense<0.000000e+00> : vector<2x8xf32>
    %230 = vector.multi_reduction <add>, %229, %cst_74 [2] : vector<2x8x8xf32> to vector<2x8xf32>
    %231 = vector.shape_cast %230 : vector<2x8xf32> to vector<2x8x1xf32>
    %232 = tpu.reciprocal %231 {approx = true} : vector<2x8x1xf32> -> vector<2x8x1xf32>
    %233 = vector.broadcast %232 : vector<2x8x1xf32> to vector<2x8x8xf32>
    %234 = arith.mulf %229, %233 : vector<2x8x8xf32>
    "tpu.trace_start"() <{level = 10 : i32, message = "bik,bkj->bij"}> : () -> ()
    %cst_75 = arith.constant dense<0.000000e+00> : vector<2x8x8xf32>
    %235 = tpu.matmul %221, %234, %cst_75 {dimension_numbers = #tpu.dot_dimension_numbers<[2], [1], [1], [2], [0, 0, 0, 1, 1, 2], [0], [0]>} : vector<2x8x8xf32>, vector<2x8x8xf32>, vector<2x8x8xf32> -> vector<2x8x8xf32>
    "tpu.trace_stop"() : () -> ()
    %236 = vector.extract_strided_slice %180 {offsets = [0, 0, 24], sizes = [2, 8, 8], strides = [1, 1, 1]} : vector<2x8x32xf32> to vector<2x8x8xf32>
    %237 = vector.extract_strided_slice %182 {offsets = [0, 0, 24], sizes = [2, 8, 8], strides = [1, 1, 1]} : vector<2x8x32xf32> to vector<2x8x8xf32>
    %238 = vector.extract_strided_slice %184 {offsets = [0, 0, 24], sizes = [2, 8, 8], strides = [1, 1, 1]} : vector<2x8x32xf32> to vector<2x8x8xf32>
    "tpu.trace_start"() <{level = 10 : i32, message = "bid,bjd->bij"}> : () -> ()
    %cst_76 = arith.constant dense<0.000000e+00> : vector<2x8x8xf32>
    %239 = tpu.matmul %236, %237, %cst_76 {dimension_numbers = #tpu.dot_dimension_numbers<[2], [2], [1], [1], [0, 0, 0, 1, 1, 1], [0], [0]>} : vector<2x8x8xf32>, vector<2x8x8xf32>, vector<2x8x8xf32> -> vector<2x8x8xf32>
    "tpu.trace_stop"() : () -> ()
    %cst_77 = arith.constant 0.353553385 : f32
    %240 = vector.broadcast %cst_77 : f32 to vector<2x8x8xf32>
    %241 = arith.mulf %239, %240 : vector<2x8x8xf32>
    %cst_78 = arith.constant dense<0xFF800000> : vector<2x8xf32>
    %242 = vector.multi_reduction <maximumf>, %241, %cst_78 [2] : vector<2x8x8xf32> to vector<2x8xf32>
    %243 = vector.shape_cast %242 : vector<2x8xf32> to vector<2x8x1xf32>
    %244 = vector.broadcast %243 : vector<2x8x1xf32> to vector<2x8x8xf32>
    %245 = arith.subf %241, %244 : vector<2x8x8xf32>
    %246 = math.exp %245 : vector<2x8x8xf32>
    %cst_79 = arith.constant dense<0.000000e+00> : vector<2x8xf32>
    %247 = vector.multi_reduction <add>, %246, %cst_79 [2] : vector<2x8x8xf32> to vector<2x8xf32>
    %248 = vector.shape_cast %247 : vector<2x8xf32> to vector<2x8x1xf32>
    %249 = tpu.reciprocal %248 {approx = true} : vector<2x8x1xf32> -> vector<2x8x1xf32>
    %250 = vector.broadcast %249 : vector<2x8x1xf32> to vector<2x8x8xf32>
    %251 = arith.mulf %246, %250 : vector<2x8x8xf32>
    "tpu.trace_start"() <{level = 10 : i32, message = "bik,bkj->bij"}> : () -> ()
    %cst_80 = arith.constant dense<0.000000e+00> : vector<2x8x8xf32>
    %252 = tpu.matmul %238, %251, %cst_80 {dimension_numbers = #tpu.dot_dimension_numbers<[2], [1], [1], [2], [0, 0, 0, 1, 1, 2], [0], [0]>} : vector<2x8x8xf32>, vector<2x8x8xf32>, vector<2x8x8xf32> -> vector<2x8x8xf32>
    "tpu.trace_stop"() : () -> ()
    %253 = tpu.concatenate %201, %218, %235, %252 in 2 : vector<2x8x8xf32>, vector<2x8x8xf32>, vector<2x8x8xf32>, vector<2x8x8xf32> -> vector<2x8x32xf32>
    %254 = vector.shape_cast %253 : vector<2x8x32xf32> to vector<16x32xf32>
    %c1_81 = arith.constant 1 : index
    %c0_82 = arith.constant 0 : index
    %c0_83 = arith.constant 0 : index
    %255 = vector.load %arg4[%c1_81, %c0_82, %c0_83] : memref<2x32x32xf32, #tpu.memory_space<vmem>>, vector<1x32x32xf32>
    %256 = vector.shape_cast %255 : vector<1x32x32xf32> to vector<32x32xf32>
    %cst_84 = arith.constant dense<0.000000e+00> : vector<16x32xf32>
    %257 = tpu.matmul %254, %256, %cst_84 {dimension_numbers = #tpu.dot_dimension_numbers<[1], [0], [0], [1], [0, 0, 1, 1], [], []>} : vector<16x32xf32>, vector<32x32xf32>, vector<16x32xf32> -> vector<16x32xf32>
    %258 = vector.broadcast %167 : vector<1x32xf32> to vector<16x32xf32>
    %259 = arith.addf %257, %258 : vector<16x32xf32>
    %260 = arith.addf %259, %163 : vector<16x32xf32>
    %cst_85 = arith.constant dense<0.000000e+00> : vector<16xf32>
    %261 = vector.multi_reduction <add>, %260, %cst_85 [1] : vector<16x32xf32> to vector<16xf32>
    %262 = vector.shape_cast %261 : vector<16xf32> to vector<16x1xf32>
    %cst_86 = arith.constant 3.200000e+01 : f32
    %263 = vector.broadcast %cst_86 : f32 to vector<16x1xf32>
    %264 = arith.divf %262, %263 : vector<16x1xf32>
    %265 = vector.broadcast %264 : vector<16x1xf32> to vector<16x32xf32>
    %266 = arith.subf %260, %265 : vector<16x32xf32>
    %267 = arith.mulf %266, %266 : vector<16x32xf32>
    %cst_87 = arith.constant dense<0.000000e+00> : vector<16xf32>
    %268 = vector.multi_reduction <add>, %267, %cst_87 [1] : vector<16x32xf32> to vector<16xf32>
    %269 = vector.shape_cast %268 : vector<16xf32> to vector<16x1xf32>
    %cst_88 = arith.constant 3.200000e+01 : f32
    %270 = vector.broadcast %cst_88 : f32 to vector<16x1xf32>
    %271 = arith.divf %269, %270 : vector<16x1xf32>
    %272 = vector.broadcast %264 : vector<16x1xf32> to vector<16x32xf32>
    %273 = arith.subf %260, %272 : vector<16x32xf32>
    %cst_89 = arith.constant 9.99999996E-13 : f32
    %274 = vector.broadcast %cst_89 : f32 to vector<16x1xf32>
    %275 = arith.addf %271, %274 : vector<16x1xf32>
    %276 = math.rsqrt %275 : vector<16x1xf32>
    %277 = vector.broadcast %276 : vector<16x1xf32> to vector<16x32xf32>
    %278 = arith.mulf %273, %277 : vector<16x32xf32>
    %279 = vector.broadcast %170 : vector<1x32xf32> to vector<16x32xf32>
    %280 = arith.mulf %279, %278 : vector<16x32xf32>
    %281 = vector.broadcast %171 : vector<1x32xf32> to vector<16x32xf32>
    %282 = arith.addf %280, %281 : vector<16x32xf32>
    %c1_90 = arith.constant 1 : index
    %c0_91 = arith.constant 0 : index
    %c0_92 = arith.constant 0 : index
    %283 = vector.load %arg5[%c1_90, %c0_91, %c0_92] : memref<2x32x64xf32, #tpu.memory_space<vmem>>, vector<1x32x64xf32>
    %284 = vector.shape_cast %283 : vector<1x32x64xf32> to vector<32x64xf32>
    %cst_93 = arith.constant dense<0.000000e+00> : vector<16x64xf32>
    %285 = tpu.matmul %282, %284, %cst_93 {dimension_numbers = #tpu.dot_dimension_numbers<[1], [0], [0], [1], [0, 0, 1, 1], [], []>} : vector<16x32xf32>, vector<32x64xf32>, vector<16x64xf32> -> vector<16x64xf32>
    %286 = vector.broadcast %168 : vector<1x64xf32> to vector<16x64xf32>
    %287 = arith.addf %285, %286 : vector<16x64xf32>
    %cst_94 = arith.constant 0.000000e+00 : f32
    %288 = vector.broadcast %cst_94 : f32 to vector<16x64xf32>
    %289 = arith.maximumf %287, %288 : vector<16x64xf32>
    %c1_95 = arith.constant 1 : index
    %c0_96 = arith.constant 0 : index
    %c0_97 = arith.constant 0 : index
    %290 = vector.load %arg6[%c1_95, %c0_96, %c0_97] : memref<2x64x32xf32, #tpu.memory_space<vmem>>, vector<1x64x32xf32>
    %291 = vector.shape_cast %290 : vector<1x64x32xf32> to vector<64x32xf32>
    %cst_98 = arith.constant dense<0.000000e+00> : vector<16x32xf32>
    %292 = tpu.matmul %289, %291, %cst_98 {dimension_numbers = #tpu.dot_dimension_numbers<[1], [0], [0], [1], [0, 0, 1, 1], [], []>} : vector<16x64xf32>, vector<64x32xf32>, vector<16x32xf32> -> vector<16x32xf32>
    %293 = vector.broadcast %169 : vector<1x32xf32> to vector<16x32xf32>
    %294 = arith.addf %292, %293 : vector<16x32xf32>
    %295 = arith.addf %294, %282 : vector<16x32xf32>
    %cst_99 = arith.constant dense<0.000000e+00> : vector<16xf32>
    %296 = vector.multi_reduction <add>, %295, %cst_99 [1] : vector<16x32xf32> to vector<16xf32>
    %297 = vector.shape_cast %296 : vector<16xf32> to vector<16x1xf32>
    %cst_100 = arith.constant 3.200000e+01 : f32
    %298 = vector.broadcast %cst_100 : f32 to vector<16x1xf32>
    %299 = arith.divf %297, %298 : vector<16x1xf32>
    %300 = vector.broadcast %299 : vector<16x1xf32> to vector<16x32xf32>
    %301 = arith.subf %295, %300 : vector<16x32xf32>
    %302 = arith.mulf %301, %301 : vector<16x32xf32>
    %cst_101 = arith.constant dense<0.000000e+00> : vector<16xf32>
    %303 = vector.multi_reduction <add>, %302, %cst_101 [1] : vector<16x32xf32> to vector<16xf32>
    %304 = vector.shape_cast %303 : vector<16xf32> to vector<16x1xf32>
    %cst_102 = arith.constant 3.200000e+01 : f32
    %305 = vector.broadcast %cst_102 : f32 to vector<16x1xf32>
    %306 = arith.divf %304, %305 : vector<16x1xf32>
    %307 = vector.broadcast %299 : vector<16x1xf32> to vector<16x32xf32>
    %308 = arith.subf %295, %307 : vector<16x32xf32>
    %cst_103 = arith.constant 9.99999996E-13 : f32
    %309 = vector.broadcast %cst_103 : f32 to vector<16x1xf32>
    %310 = arith.addf %306, %309 : vector<16x1xf32>
    %311 = math.rsqrt %310 : vector<16x1xf32>
    %312 = vector.broadcast %311 : vector<16x1xf32> to vector<16x32xf32>
    %313 = arith.mulf %308, %312 : vector<16x32xf32>
    %314 = vector.broadcast %172 : vector<1x32xf32> to vector<16x32xf32>
    %315 = arith.mulf %314, %313 : vector<16x32xf32>
    %316 = vector.broadcast %173 : vector<1x32xf32> to vector<16x32xf32>
    %317 = arith.addf %315, %316 : vector<16x32xf32>
    %c0_104 = arith.constant 0 : index
    %c0_105 = arith.constant 0 : index
    %318 = vector.load %arg8[%c0_104, %c0_105] : memref<16x32xf32, #tpu.memory_space<vmem>>, vector<16x32xf32>
    tpu.vector_store %arg8[%c0_104, %c0_105], %317 {strides = array<i32>} : memref<16x32xf32, #tpu.memory_space<vmem>>, vector<16x32xf32>,
    return
  }
}

</mosaic_0001>

<bundles_post_ra>
// kernel: _lambda_.1
= control target key start
LH: loop header
LB: loop body
LE: loop exit
PB: predicated region body
PF: predicated region fallthrough
CT: control target
= control target key end

     0   :  { %v4488_v2 = vmov 0   ;;  %v4489_v11 = vmov 0.0   ;;  %s5180_s0 = inlined_call_operand.vmem [shape: s32[16,1], index: 0, kind: input, shape index: {}]   ;;  %s5181_s1 = inlined_call_operand.vmem [shape: f32[100,32], index: 1, kind: input, shape index: {}]   ;;  %s5182_s2 = inlined_call_operand.vmem [shape: f32[16,32], index: 2, kind: input, shape index: {}]   ;;  %s5183_s3 = inlined_call_operand.vmem [shape: f32[2,32,96], index: 3, kind: input, shape index: {}]   ;;  %s5184_s4 = inlined_call_operand.vmem [shape: f32[2,32,32], index: 4, kind: input, shape index: {}]   ;;  %s5185_s5 = inlined_call_operand.vmem [shape: f32[2,32,64], index: 5, kind: input, shape index: {}]   ;;  %s5186_s6 = inlined_call_operand.vmem [shape: f32[2,64,32], index: 6, kind: input, shape index: {}]   ;;  %s5187_s7 = inlined_call_operand.vmem [shape: f32[2,8,128], index: 7, kind: input, shape index: {}]   ;;  %s5188_s8 = inlined_call_operand.hbm [shape: f32[16,32], index: 8, kind: output, shape index: {}]  }
   0x1   :  { %v30_v0 = vld [vmem:[%s5180_s0] sm:$0xff]  ;;  %4383 = vset.pattern.permute.xlu0 %v4488_v2  ;;  %v47_v3 = vld [vmem:[%s5181_s1 + $0x8] sm:$0xff]  ;;  %v48_v4 = vld [vmem:[%s5181_s1 + $0x10] sm:$0xff]  ;;  %4007 = vmatprep.subr.mxu1 %v4489_v11 }
   0x2   :  { %v46_v1 = vld [vmem:[%s5181_s1] sm:$0xff]  ;;  %v49_v5 = vld [vmem:[%s5181_s1 + $0x18] sm:$0xff]  ;;  %35 = vperm.xlu0 %4383, %v30_v0   ;;  %v31_v8 = vld [vmem:[%s5180_s0 + $0x8] sm:$0xff] }
   0x3   :  { %v4260_v6 = vpack.c.bf16 %v47_v3, %v46_v1  ;;  %v4264_v7 = vpack.c.bf16 %v49_v5, %v48_v4  ;;  %v50_v9 = vld [vmem:[%s5181_s1 + $0x20] sm:$0xff]  ;;  %v51_v10 = vld [vmem:[%s5181_s1 + $0x28] sm:$0xff] }
   0x5   :  { %4261 = vmatprep.subr.bf16.mxu0 %v4260_v6 }
   0x6   :  { %13 = vsyncpa [#allocation3], 0  ;;  %4263 = vmatpush3.bf16.msra.mxu0 %v4260_v6  ;;  %38 = vperm.xlu0 %4383, %v31_v8   ;;  %v4268_v12 = vpack.c.bf16 %v51_v10, %v50_v9  ;;  %v52_v13 = vld [vmem:[%s5181_s1 + $0x30] sm:$0xff]  ;;  %v53_v14 = vld [vmem:[%s5181_s1 + $0x38] sm:$0xff]  ;;  %vm68_vm0 = vcmask 1043456   ;;  %v32_v26 = vlaneseq  ;;  %vm61_vm1 = vcmask 818176  }
   0x7   :  { %4265 = vmatprep.subr.bf16.mxu0 %v4264_v7  ;;  %v4272_v15 = vpack.c.bf16 %v53_v14, %v52_v13  ;;  %v54_v16 = vld [vmem:[%s5181_s1 + $0x40] sm:$0xff]  ;;  %v55_v17 = vld [vmem:[%s5181_s1 + $0x48] sm:$0xff]  ;;  %v56_v19 = vld [vmem:[%s5181_s1 + $0x50] sm:$0xff]  ;;  %vm156_vm4 = vcmask 261120   ;;  %vm4490_vm5 = vmmov 0   ;;  %s4491_s23 = smov 96  }
   0x8   :  { %v4276_v18 = vpack.c.bf16 %v55_v17, %v54_v16  ;;  %v57_v20 = vld [vmem:[%s5181_s1 + $0x58] sm:$0xff]  ;;  %v58_v22 = vld [vmem:[%s5181_s1 + $0x60] sm:$0xf]  ;;  %v149_v24 = vld [vmem:[%s5183_s3 + $0x8] sm:$0xff]  ;;  %v33_v27 = vand.u32 127, %v32_v26  ;;  %v4627_v41 = vshrl.u32 %v32_v26, 7  ;;  %4009 = vmatprep.mubr.msk.f32.mxu1 %vm4490_vm5, %v4489_v11 }
   0x9   :  { %v4280_v21 = vpack.c.bf16 %v57_v20, %v56_v19  ;;  %v148_v23 = vld [vmem:[%s5183_s3] sm:$0xff]  ;;  %v150_v32 = vld [vmem:[%s5183_s3 + $0x10] sm:$0xff]  ;;  %v151_v33 = vld [vmem:[%s5183_s3 + $0x18] sm:$0xff]  ;;  %vm241_vm6 = vcmask 64512   ;;  %s4492_s24 = smov 64   ;;  %s4493_s25 = smov 88  }
   0xa   :  { %4267 = vmatpush3.bf16.msra.mxu0 %v4264_v7  ;;  %v4284_v25 = vpack.c.bf16 %v149_v24, %v148_v23  ;;  %v4288_v34 = vpack.c.bf16 %v151_v33, %v150_v32  ;;  %v59_v35 = vld [vmem:[%s5182_s2] sm:$0xff]  ;;  %v60_v36 = vld [vmem:[%s5182_s2 + $0x8] sm:$0xff]  ;;  %v154_v42 = vsub.s32 0, %v4627_v41  ;;  %s4494_s26 = smov 120   ;;  %s4495_s27 = smov 56   ;;  %vm1575_vm7 = vcmask 130048  }
   0xb   :  { %4269 = vmatprep.subr.bf16.mxu0 %v4268_v12  ;;  %v4637_v43 = vld [vmem:[%s5187_s7] sm:$0xff]  ;;  %s4496_s28 = smov 80   ;;  %s4497_s29 = smov 112   ;;  %vm1578_vm8 = vcmask 195584   ;;  %vm1814_vm9 = vcmask 523264  }
   0xc   :  { %v155_v44 = vrot.slane %v4637_v43, %v154_v42  ;;  %s4498_s30 = smov 48   ;;  %s4499_s9 = smov 72  }
   0xd   :  { %s4500_s10 = smov 104   ;;  %s4501_s11 = smov 40  }
   0xe   :  { %4271 = vmatpush3.bf16.msra.mxu0 %v4268_v12  ;;  %s4502_s12 = smov 8   ;;  %s4503_s13 = smov 16  }
   0xf   :  { %4273 = vmatprep.subr.bf16.mxu0 %v4272_v15  ;;  %s4504_s21 = smov 24  }
  0x12   :  { %4275 = vmatpush3.bf16.msra.mxu0 %v4272_v15 }
  0x13   :  { %4277 = vmatprep.subr.bf16.mxu0 %v4276_v18 }
  0x16   :  { %4279 = vmatpush3.bf16.msra.mxu0 %v4276_v18 }
  0x17   :  { %4281 = vmatprep.subr.bf16.mxu0 %v4280_v21 }
  0x1a   :  { %4283 = vmatpush3.bf16.msra.mxu0 %v4280_v21 }
  0x1b   :  { %3991 = vmatprep.subr.msk.mxu0 %vm68_vm0, %v58_v22 }
  0x1e   :  { %3992 = vmatpush3.msk.msra.mxu0 %vm68_vm0, %v58_v22 }
  0x1f   :  { %4285 = vmatprep.subr.bf16.mxu0 %v4284_v25 }
  0x81   :  { %v36_v28 = vpop.permute.xlu0 %35 }
  0x82   :  { %vm40_vm2 = vcmp.eq.s32.totalorder %v33_v27, %v36_v28 }
  0x83   :  { %v3742_v29 = vsel %vm40_vm2, 1.0, %v4489_v11 }
  0x84   :  { %3993 = vmatprep.mubr.msk.f32.mxu0 %vm61_vm1, %v3742_v29 }
  0x85   :  { %v39_v30 = vpop.permute.xlu0 %38 }
  0x86   :  { %vm41_vm3 = vcmp.eq.s32.totalorder %v33_v27, %v39_v30 }
  0x87   :  { %v3743_v31 = vsel %vm41_vm3, 1.0, %v4489_v11 }
  0x88   :  { %3994 = vmatmul.mubr.msk.f32.vlgmr.msra.gmra.mrb[0].mxu0 %vm61_vm1, %v3743_v31 }
  0x89   :  { %4287 = vmatpush3.bf16.msra.mxu0 %v4284_v25 }
  0x8a   :  { %4289 = vmatprep.subr.bf16.mxu0 %v4288_v34 }
  0x8d   :  { %4291 = vmatpush3.bf16.msra.mxu0 %v4288_v34 }
  0x8e   :  { %4032 = vmatprep.subr.mxu0 %v4489_v11 }
 0x15b   :  { %v3995_v37 = vpop.f32.mrb[0].mxu0 }
 0x15c   :  { %v138_v38 = vpop.f32.mrb[1].mxu0  ;;  %v4621_v40 = vadd.f32 %v3995_v37, %v60_v36 }
 0x15d   :  { %v4619_v39 = vadd.f32 %v138_v38, %v59_v35 }
 0x15f   :  { %4004 = vmatprep.mubr.msk.f32.mxu0 %vm156_vm4, %v4619_v39 }
 0x160   :  { %4005 = vmatmul.mubr.msk.f32.vlgmr.msra.gmra.mrb[2].mxu0 %vm156_vm4, %v4621_v40 }
 0x161   :  { %4034 = vmatprep.mubr.msk.f32.mxu0 %vm4490_vm5, %v4489_v11 }
 0x233   :  { %v4006_v45 = vpop.f32.mrb[2].mxu0 }
 0x234   :  { %v229_v46 = vpop.f32.mrb[3].mxu0  ;;  %v4646_v48 = vadd.f32 %v4006_v45, %v155_v44 }
 0x235   :  { %v4642_v47 = vadd.f32 %v229_v46, %v155_v44 }
 0x237   :  { %239 = vrot.lane.b32.xlu1 %v4642_v47, %s4491_s23 }
 0x23b   :  { %317 = vrot.lane.b32.xlu1 %v4646_v48, %s4491_s23 }
 0x2a9   :  { %v240_v49 = vpop.permute.xlu1 %239 }
 0x2aa   :  { %4008 = vmatpush3.xpose.msk.msra.mxu1 %vm241_vm6, %v240_v49 }
 0x2ab   :  { %4012 = vmatprep.subr.mxu1 %v4489_v11 }
 0x2ad   :  { %4010 = vmatmul.mubr.msk.f32.vlgmr.msra.gmra.mrb[0].mxu1 %vm241_vm6, %v4642_v47  ;;  %v318_v50 = vpop.permute.xlu1 %317 }
 0x2ae   :  { %4013 = vmatpush3.xpose.msk.msra.mxu1 %vm241_vm6, %v318_v50  ;;  %4014 = vmatprep.mubr.msk.f32.mxu1 %vm4490_vm5, %v4489_v11 }
 0x2af   :  { %4017 = vmatprep.subr.mxu1 %v4489_v11 }
 0x2b1   :  { %4015 = vmatmul.mubr.msk.f32.vlgmr.msra.gmra.mrb[2].mxu1 %vm241_vm6, %v4646_v48 }
 0x2b2   :  { %4019 = vmatprep.mubr.msk.f32.mxu1 %vm4490_vm5, %v4489_v11 }
 0x380   :  { %v312_v51 = vpop.f32.mrb[0].mxu1 }
 0x381   :  { %v393_v52 = vmul.f32 0.35355338, %v312_v51  ;;  %v4011_v53 = vpop.f32.mrb[1].mxu1 }
 0x383   :  { %v395_v54 = vsel %vm241_vm6, %v393_v52, -inf }
 0x384   :  { %396 = vmax.xlane.f32.xlu0 %v395_v54  ;;  %v389_v55 = vpop.f32.mrb[2].mxu1 }
 0x385   :  { %v394_v56 = vmul.f32 0.35355338, %v389_v55  ;;  %v4016_v57 = vpop.f32.mrb[3].mxu1 }
 0x387   :  { %v398_v58 = vsel %vm241_vm6, %v394_v56, -inf }
 0x388   :  { %399 = vmax.xlane.f32.xlu1 %v398_v58 }
 0x399   :  { %417 = vrot.lane.b32.xlu1 %v4642_v47, %s4492_s24 }
 0x39d   :  { %567 = vrot.lane.b32.xlu1 %v4642_v47, %s4493_s25 }
 0x3a1   :  { %645 = vrot.lane.b32.xlu1 %v4646_v48, %s4493_s25 }
 0x3a5   :  { %643 = vrot.lane.b32.xlu1 %v4646_v48, %s4494_s26 }
 0x411   :  { %v397_v59 = vpop.xlane.xlu0 %396 }
 0x412   :  { %v401_v60 = vsub.f32 %v393_v52, %v397_v59 }
 0x414   :  { %v403_v61 = vmul.f32 1.442695, %v401_v60 }
 0x415   :  { %v400_v62 = vpop.xlane.xlu1 %399 }
 0x416   :  { %4384 = vpow2.f32 %v403_v61  ;;  %v402_v63 = vsub.f32 %v394_v56, %v400_v62 }
 0x418   :  { %v405_v0 = vmul.f32 1.442695, %v402_v63 }
 0x419   :  { %v418_v1 = vpop.permute.xlu1 %417 }
 0x41a   :  { %4386 = vpow2.f32 %v405_v0 }
 0x41d   :  { %v568_v2 = vpop.permute.xlu1 %567 }
 0x420   :  { %v4385_v3 = vpop.eup %4384 }
 0x421   :  { %v646_v4 = vpop.permute.xlu1 %645  ;;  %v407_v5 = vsel %vm241_vm6, %v4385_v3, 0.0 }
 0x422   :  { %408 = vadd.xlane.f32.xlu0 %v407_v5  ;;  %4033 = vmatpush3.xpose.msk.msra.mxu0 %vm241_vm6, %v646_v4 }
 0x423   :  { %4042 = vmatprep.subr.mxu0 %v4489_v11 }
 0x424   :  { %v4387_v6 = vpop.eup %4386 }
 0x425   :  { %v644_v7 = vpop.permute.xlu1 %643  ;;  %v410_v8 = vsel %vm241_vm6, %v4387_v6, 0.0 }
 0x426   :  { %411 = vadd.xlane.f32.xlu0 %v410_v8  ;;  %4035 = vmatmul.mubr.msk.f32.vlgmr.msra.gmra.mrb[4].mxu0 %vm241_vm6, %v644_v7 }
 0x427   :  { %4044 = vmatprep.mubr.msk.f32.mxu0 %vm4490_vm5, %v4489_v11 }
 0x43c   :  { %491 = vrot.lane.b32.xlu0 %v4646_v48, %s4492_s24 }
 0x440   :  { %565 = vrot.lane.b32.xlu0 %v4642_v47, %s4494_s26 }
 0x4af   :  { %v409_v9 = vpop.xlane.xlu0 %408 }
 0x4b0   :  { %4388 = vrcp.f32 %v409_v9 }
 0x4b3   :  { %v412_v10 = vpop.xlane.xlu0 %411 }
 0x4b4   :  { %4390 = vrcp.f32 %v412_v10 }
 0x4b7   :  { %v492_v16 = vpop.permute.xlu0 %491 }
 0x4ba   :  { %v4389_v12 = vpop.eup %4388 }
 0x4bb   :  { %v415_v13 = vmul.f32 %v4389_v12, %v4385_v3  ;;  %v566_v17 = vpop.permute.xlu0 %565 }
 0x4bd   :  { %4018 = vmatpush3.msra.mxu1 %v415_v13 }
 0x4be   :  { %v4391_v14 = vpop.eup %4390  ;;  %4020 = vmatmul.mubr.msk.f32.vlgmr.msra.gmra.mrb[4].mxu1 %vm241_vm6, %v418_v1  ;;  %4022 = vmatprep.subr.mxu1 %v4489_v11 }
 0x4bf   :  { %v416_v15 = vmul.f32 %v4391_v14, %v4387_v6  ;;  %4024 = vmatprep.mubr.msk.f32.mxu1 %vm4490_vm5, %v4489_v11 }
 0x4c1   :  { %4023 = vmatpush3.msra.mxu1 %v416_v15 }
 0x4c2   :  { %4025 = vmatmul.mubr.msk.f32.vlgmr.msra.gmra.mrb[6].mxu1 %vm241_vm6, %v492_v16  ;;  %4027 = vmatprep.subr.mxu1 %v4489_v11 }
 0x4c3   :  { %4029 = vmatprep.mubr.msk.f32.mxu1 %vm4490_vm5, %v4489_v11 }
 0x4c8   :  { %4028 = vmatpush3.xpose.msk.msra.mxu1 %vm241_vm6, %v568_v2 }
 0x4c9   :  { %4037 = vmatprep.subr.mxu1 %v4489_v11 }
 0x4cb   :  { %4030 = vmatmul.mubr.msk.f32.vlgmr.msra.gmra.mrb[8].mxu1 %vm241_vm6, %v566_v17 }
 0x4cc   :  { %4039 = vmatprep.mubr.msk.f32.mxu1 %vm4490_vm5, %v4489_v11 }
 0x4f9   :  { %v717_v18 = vpop.f32.mrb[4].mxu0 }
 0x4fa   :  { %v722_v19 = vmul.f32 0.35355338, %v717_v18  ;;  %v4036_v20 = vpop.f32.mrb[5].mxu0 }
 0x4fc   :  { %v726_v21 = vsel %vm241_vm6, %v722_v19, -inf }
 0x4fd   :  { %727 = vmax.xlane.f32.xlu1 %v726_v21 }
 0x50e   :  { %745 = vrot.lane.b32.xlu1 %v4642_v47, %s4495_s27 }
 0x512   :  { %895 = vrot.lane.b32.xlu1 %v4642_v47, %s4496_s28 }
 0x516   :  { %973 = vrot.lane.b32.xlu1 %v4646_v48, %s4496_s28 }
 0x51a   :  { %971 = vrot.lane.b32.xlu1 %v4646_v48, %s4497_s29 }
 0x58a   :  { %v728_v30 = vpop.xlane.xlu1 %727 }
 0x58b   :  { %v730_v31 = vsub.f32 %v722_v19, %v728_v30 }
 0x58d   :  { %v733_v34 = vmul.f32 1.442695, %v730_v31 }
 0x58e   :  { %v746_v49 = vpop.permute.xlu1 %745 }
 0x591   :  { %v4705_v22 = vpop.f32.mrb[4].mxu1 }
 0x592   :  { %v4021_v23 = vpop.f32.mrb[5].mxu1  ;;  %v896_v53 = vpop.permute.xlu1 %895 }
 0x595   :  { %v4707_v24 = vpop.f32.mrb[6].mxu1 }
 0x596   :  { %v4026_v25 = vpop.f32.mrb[7].mxu1  ;;  %v974_v56 = vpop.permute.xlu1 %973 }
 0x59a   :  { %v972_v58 = vpop.permute.xlu1 %971 }
 0x59e   :  { %v639_v26 = vpop.f32.mrb[8].mxu1 }
 0x59f   :  { %v721_v27 = vmul.f32 0.35355338, %v639_v26  ;;  %v4031_v28 = vpop.f32.mrb[9].mxu1 }
 0x5a1   :  { %v723_v29 = vsel %vm241_vm6, %v721_v27, -inf }
 0x5a2   :  { %724 = vmax.xlane.f32.xlu0 %v723_v29 }
 0x62f   :  { %v725_v32 = vpop.xlane.xlu0 %724 }
 0x630   :  { %v729_v33 = vsub.f32 %v721_v27, %v725_v32 }
 0x632   :  { %v731_v35 = vmul.f32 1.442695, %v729_v33 }
 0x634   :  { %4392 = vpow2.f32 %v731_v35 }
 0x635   :  { %4394 = vpow2.f32 %v733_v34 }
 0x63e   :  { %v4393_v36 = vpop.eup %4392 }
 0x63f   :  { %v735_v37 = vsel %vm241_vm6, %v4393_v36, 0.0  ;;  %v4395_v38 = vpop.eup %4394 }
 0x640   :  { %736 = vadd.xlane.f32.xlu0 %v735_v37  ;;  %v738_v44 = vsel %vm241_vm6, %v4395_v38, 0.0 }
 0x644   :  { %739 = vadd.xlane.f32.xlu0 %v738_v44 }
 0x65a   :  { %819 = vrot.lane.b32.xlu0 %v4646_v48, %s4495_s27 }
 0x65e   :  { %893 = vrot.lane.b32.xlu0 %v4642_v47, %s4497_s29 }
 0x6cd   :  { %v737_v45 = vpop.xlane.xlu0 %736 }
 0x6ce   :  { %4396 = vrcp.f32 %v737_v45 }
 0x6d1   :  { %v740_v46 = vpop.xlane.xlu0 %739 }
 0x6d2   :  { %4398 = vrcp.f32 %v740_v46 }
 0x6d5   :  { %v820_v55 = vpop.permute.xlu0 %819 }
 0x6d8   :  { %v4397_v50 = vpop.eup %4396 }
 0x6d9   :  { %v743_v51 = vmul.f32 %v4397_v50, %v4393_v36  ;;  %v894_v57 = vpop.permute.xlu0 %893 }
 0x6db   :  { %4038 = vmatpush3.msra.mxu1 %v743_v51 }
 0x6dc   :  { %v4399_v52 = vpop.eup %4398  ;;  %4040 = vmatmul.mubr.msk.f32.vlgmr.msra.gmra.mrb[10].mxu1 %vm241_vm6, %v746_v49  ;;  %4047 = vmatprep.subr.mxu1 %v4489_v11 }
 0x6dd   :  { %v744_v54 = vmul.f32 %v4399_v52, %v4395_v38  ;;  %4049 = vmatprep.mubr.msk.f32.mxu1 %vm4490_vm5, %v4489_v11 }
 0x6df   :  { %4043 = vmatpush3.msra.mxu0 %v744_v54 }
 0x6e0   :  { %4045 = vmatmul.mubr.msk.f32.vlgmr.msra.gmra.mrb[6].mxu0 %vm241_vm6, %v820_v55  ;;  %4052 = vmatprep.subr.mxu0 %v4489_v11 }
 0x6e1   :  { %4054 = vmatprep.mubr.msk.f32.mxu0 %vm4490_vm5, %v4489_v11 }
 0x6e2   :  { %4048 = vmatpush3.xpose.msk.msra.mxu1 %vm241_vm6, %v896_v53 }
 0x6e3   :  { %4057 = vmatprep.subr.mxu1 %v4489_v11 }
 0x6e5   :  { %4050 = vmatmul.mubr.msk.f32.vlgmr.msra.gmra.mrb[12].mxu1 %vm241_vm6, %v894_v57 }
 0x6e6   :  { %4053 = vmatpush3.xpose.msk.msra.mxu0 %vm241_vm6, %v974_v56  ;;  %4059 = vmatprep.mubr.msk.f32.mxu1 %vm4490_vm5, %v4489_v11 }
 0x6e7   :  { %4062 = vmatprep.subr.mxu0 %v4489_v11 }
 0x6e9   :  { %4055 = vmatmul.mubr.msk.f32.vlgmr.msra.gmra.mrb[8].mxu0 %vm241_vm6, %v972_v58 }
 0x6ea   :  { %4064 = vmatprep.mubr.msk.f32.mxu0 %vm4490_vm5, %v4489_v11 }
 0x7af   :  { %v4734_v59 = vpop.f32.mrb[10].mxu1 }
 0x7b0   :  { %v4041_v60 = vpop.f32.mrb[11].mxu1 }
 0x7b3   :  { %v4736_v61 = vpop.f32.mrb[6].mxu0 }
 0x7b4   :  { %v4046_v62 = vpop.f32.mrb[7].mxu0 }
 0x7b8   :  { %v967_v63 = vpop.f32.mrb[12].mxu1 }
 0x7b9   :  { %v1049_v0 = vmul.f32 0.35355338, %v967_v63  ;;  %v4051_v1 = vpop.f32.mrb[13].mxu1 }
 0x7bb   :  { %v1051_v2 = vsel %vm241_vm6, %v1049_v0, -inf }
 0x7bc   :  { %v1045_v3 = vpop.f32.mrb[8].mxu0  ;;  %1052 = vmax.xlane.f32.xlu0 %v1051_v2 }
 0x7bd   :  { %v1050_v4 = vmul.f32 0.35355338, %v1045_v3  ;;  %v4056_v5 = vpop.f32.mrb[9].mxu0 }
 0x7bf   :  { %v1054_v6 = vsel %vm241_vm6, %v1050_v4, -inf }
 0x7c0   :  { %1055 = vmax.xlane.f32.xlu1 %v1054_v6  ;;  %v1583_v6 = vld [vmem:[%s5184_s4 + $0x10] sm:$0xff] }
 0x7d1   :  { %1073 = vrot.lane.b32.xlu1 %v4642_v47, %s4498_s30 }
 0x7d5   :  { %1223 = vrot.lane.b32.xlu1 %v4642_v47, %s4499_s9 }
 0x7d9   :  { %1301 = vrot.lane.b32.xlu1 %v4646_v48, %s4499_s9 }
 0x7dd   :  { %1299 = vrot.lane.b32.xlu1 %v4646_v48, %s4500_s10 }
 0x849   :  { %v1053_v7 = vpop.xlane.xlu0 %1052 }
 0x84a   :  { %v1057_v8 = vsub.f32 %v1049_v0, %v1053_v7  ;;  %v1584_v7 = vld [vmem:[%s5184_s4 + $0x18] sm:$0xff] }
 0x84c   :  { %v1059_v9 = vmul.f32 1.442695, %v1057_v8  ;;  %v4296_v8 = vpack.c.bf16 %v1584_v7, %v1583_v6  ;;  %v1701_v6 = vsub.s32 4, %v4627_v41  ;;  %v1707_v7 = vsub.s32 5, %v4627_v41 }
 0x84d   :  { %v1056_v10 = vpop.xlane.xlu1 %1055 }
 0x84e   :  { %4400 = vpow2.f32 %v1059_v9  ;;  %v1058_v12 = vsub.f32 %v1050_v4, %v1056_v10  ;;  %v1582_v4 = vld [vmem:[%s5184_s4 + $0x8] sm:$0xff] }
 0x850   :  { %v1061_v13 = vmul.f32 1.442695, %v1058_v12 }
 0x851   :  { %v1074_v20 = vpop.permute.xlu1 %1073 }
 0x852   :  { %4402 = vpow2.f32 %v1061_v13 }
 0x855   :  { %v1224_v26 = vpop.permute.xlu1 %1223 }
 0x858   :  { %v4401_v14 = vpop.eup %4400 }
 0x859   :  { %v1063_v15 = vsel %vm241_vm6, %v4401_v14, 0.0  ;;  %v1302_v29 = vpop.permute.xlu1 %1301 }
 0x85a   :  { %1064 = vadd.xlane.f32.xlu0 %v1063_v15 }
 0x85c   :  { %v4403_v16 = vpop.eup %4402 }
 0x85d   :  { %v1066_v17 = vsel %vm241_vm6, %v4403_v16, 0.0  ;;  %v1300_v31 = vpop.permute.xlu1 %1299 }
 0x85e   :  { %1067 = vadd.xlane.f32.xlu0 %v1066_v17 }
 0x874   :  { %1147 = vrot.lane.b32.xlu0 %v4646_v48, %s4498_s30 }
 0x878   :  { %1221 = vrot.lane.b32.xlu0 %v4642_v47, %s4500_s10 }
 0x8e7   :  { %v1065_v18 = vpop.xlane.xlu0 %1064 }
 0x8e8   :  { %4404 = vrcp.f32 %v1065_v18 }
 0x8eb   :  { %v1068_v19 = vpop.xlane.xlu0 %1067 }
 0x8ec   :  { %4406 = vrcp.f32 %v1068_v19 }
 0x8ef   :  { %v1148_v28 = vpop.permute.xlu0 %1147 }
 0x8f2   :  { %v4405_v21 = vpop.eup %4404 }
 0x8f3   :  { %v1071_v23 = vmul.f32 %v4405_v21, %v4401_v14  ;;  %v1222_v30 = vpop.permute.xlu0 %1221 }
 0x8f5   :  { %4058 = vmatpush3.msra.mxu1 %v1071_v23 }
 0x8f6   :  { %v4407_v25 = vpop.eup %4406  ;;  %4060 = vmatmul.mubr.msk.f32.vlgmr.msra.gmra.mrb[14].mxu1 %vm241_vm6, %v1074_v20  ;;  %4067 = vmatprep.subr.mxu1 %v4489_v11 }
 0x8f7   :  { %v1072_v27 = vmul.f32 %v4407_v25, %v4403_v16  ;;  %4069 = vmatprep.mubr.msk.f32.mxu1 %vm4490_vm5, %v4489_v11 }
 0x8f9   :  { %4063 = vmatpush3.msra.mxu0 %v1072_v27 }
 0x8fa   :  { %4065 = vmatmul.mubr.msk.f32.vlgmr.msra.gmra.mrb[10].mxu0 %vm241_vm6, %v1148_v28  ;;  %4072 = vmatprep.subr.mxu0 %v4489_v11 }
 0x8fb   :  { %4074 = vmatprep.mubr.msk.f32.mxu0 %vm4490_vm5, %v4489_v11 }
 0x8fc   :  { %4068 = vmatpush3.xpose.msk.msra.mxu1 %vm241_vm6, %v1224_v26 }
 0x8fd   :  { %4077 = vmatprep.subr.mxu1 %v4489_v11 }
 0x8ff   :  { %4070 = vmatmul.mubr.msk.f32.vlgmr.msra.gmra.mrb[16].mxu1 %vm241_vm6, %v1222_v30 }
 0x900   :  { %4073 = vmatpush3.xpose.msk.msra.mxu0 %vm241_vm6, %v1302_v29  ;;  %4079 = vmatprep.mubr.msk.f32.mxu1 %vm4490_vm5, %v4489_v11 }
 0x901   :  { %4082 = vmatprep.subr.mxu0 %v4489_v11 }
 0x903   :  { %4075 = vmatmul.mubr.msk.f32.vlgmr.msra.gmra.mrb[12].mxu0 %vm241_vm6, %v1300_v31 }
 0x904   :  { %4084 = vmatprep.mubr.msk.f32.mxu0 %vm4490_vm5, %v4489_v11 }
 0x9c9   :  { %v1143_v32 = vpop.f32.mrb[14].mxu1 }
 0x9ca   :  { %v4061_v33 = vpop.f32.mrb[15].mxu1 }
 0x9cd   :  { %v1217_v34 = vpop.f32.mrb[10].mxu0 }
 0x9ce   :  { %v4066_v35 = vpop.f32.mrb[11].mxu0 }
 0x9d2   :  { %v1295_v36 = vpop.f32.mrb[16].mxu1 }
 0x9d3   :  { %v1377_v37 = vmul.f32 0.35355338, %v1295_v36  ;;  %v4071_v38 = vpop.f32.mrb[17].mxu1 }
 0x9d5   :  { %v1379_v44 = vsel %vm241_vm6, %v1377_v37, -inf }
 0x9d6   :  { %v1373_v45 = vpop.f32.mrb[12].mxu0  ;;  %1380 = vmax.xlane.f32.xlu0 %v1379_v44 }
 0x9d7   :  { %v1378_v46 = vmul.f32 0.35355338, %v1373_v45  ;;  %v4076_v49 = vpop.f32.mrb[13].mxu0 }
 0x9d9   :  { %v1382_v50 = vsel %vm241_vm6, %v1378_v46, -inf }
 0x9da   :  { %1383 = vmax.xlane.f32.xlu1 %v1382_v50 }
 0x9eb   :  { %1401 = vrot.lane.b32.xlu1 %v4642_v47, %s4501_s11 }
 0x9ef   :  { %1551 = vrot.lane.b32.xlu1 %v4734_v59, %s4502_s12 }
 0x9f3   :  { %1553 = vrot.lane.b32.xlu1 %v4736_v61, %s4502_s12 }
 0x9f7   :  { %1561 = vrot.lane.b32.xlu1 %v1217_v34, %s4503_s13 }
 0xa63   :  { %v1381_v51 = vpop.xlane.xlu0 %1380 }
 0xa64   :  { %v1385_v52 = vsub.f32 %v1377_v37, %v1381_v51 }
 0xa66   :  { %v1387_v55 = vmul.f32 1.442695, %v1385_v52  ;;  %v1712_v52 = vld [vmem:[%s5185_s5 + $0x8] sm:$0xff] }
 0xa67   :  { %v1384_v53 = vpop.xlane.xlu1 %1383 }
 0xa68   :  { %v1386_v54 = vsub.f32 %v1378_v46, %v1384_v53 }
 0xa6a   :  { %v1389_v56 = vmul.f32 1.442695, %v1386_v54  ;;  %v1713_v54 = vld [vmem:[%s5185_s5 + $0x10] sm:$0xff] }
 0xa6b   :  { %v1402_v3 = vpop.permute.xlu1 %1401 }
 0xa6c   :  { %4408 = vpow2.f32 %v1389_v56 }
 0xa6d   :  { %4410 = vpow2.f32 %v1387_v55  ;;  %v1714_v55 = vld [vmem:[%s5185_s5 + $0x18] sm:$0xff] }
 0xa6e   :  { %v4304_v56 = vpack.c.bf16 %v1714_v55, %v1713_v54 }
 0xa6f   :  { %v1552_v14 = vpop.permute.xlu1 %1551 }
 0xa70   :  { %v1573_v18 = vsel %vm241_vm6, %v4705_v22, %v1552_v14  ;;  %v1587_v22 = vsub.s32 1, %v4627_v41 }
 0xa72   :  { %v1588_v28 = vrot.slane %v4637_v43, %v1587_v22 }
 0xa73   :  { %v1554_v15 = vpop.permute.xlu1 %1553 }
 0xa74   :  { %v1574_v20 = vsel %vm241_vm6, %v4707_v24, %v1554_v15 }
 0xa76   :  { %v4409_v57 = vpop.eup %4408 }
 0xa77   :  { %v1394_v47 = vsel %vm241_vm6, %v4409_v57, 0.0  ;;  %v4411_v58 = vpop.eup %4410  ;;  %v1562_v16 = vpop.permute.xlu1 %1561 }
 0xa78   :  { %1395 = vadd.xlane.f32.xlu0 %v1394_v47  ;;  %v1391_v59 = vsel %vm241_vm6, %v4411_v58, 0.0  ;;  %v1577_v25 = vsel %vm1575_vm7, %v1574_v20, %v1562_v16  ;;  %v1803_v47 = vld [vmem:[%s5186_s6 + $0x8] sm:$0xff]  ;;  %v1809_v20 = vld [vmem:[%s5186_s6 + $0x38] sm:$0xff] }
 0xa7c   :  { %1392 = vadd.xlane.f32.xlu0 %v1391_v59 }
 0xa92   :  { %1475 = vrot.lane.b32.xlu0 %v4646_v48, %s4501_s11  ;;  %v1581_v48 = vld [vmem:[%s5184_s4] sm:$0xff] }
 0xa93   :  { %v4292_v5 = vpack.c.bf16 %v1582_v4, %v1581_v48 }
 0xa96   :  { %1559 = vrot.lane.b32.xlu0 %v1143_v32, %s4503_s13 }
 0xb05   :  { %v1396_v60 = vpop.xlane.xlu0 %1395 }
 0xb06   :  { %4412 = vrcp.f32 %v1396_v60  ;;  %v1805_v60 = vld [vmem:[%s5186_s6 + $0x18] sm:$0xff] }
 0xb09   :  { %v1393_v61 = vpop.xlane.xlu0 %1392 }
 0xb0a   :  { %4414 = vrcp.f32 %v1393_v61 }
 0xb0d   :  { %v1476_v0 = vpop.permute.xlu0 %1475 }
 0xb10   :  { %v4413_v62 = vpop.eup %4412 }
 0xb11   :  { %v1400_v63 = vmul.f32 %v4413_v62, %v4409_v57  ;;  %v1560_v17 = vpop.permute.xlu0 %1559  ;;  %v1802_v57 = vld [vmem:[%s5186_s6] sm:$0xff] }
 0xb12   :  { %v1576_v21 = vsel %vm1575_vm7, %v1573_v18, %v1560_v17  ;;  %v4308_v59 = vpack.c.bf16 %v1803_v47, %v1802_v57  ;;  %v1806_v62 = vld [vmem:[%s5186_s6 + $0x20] sm:$0xff]  ;;  %v3781_v57 = vld [vmem:[%s5183_s3 + $0x28] sm:$0xff] }
 0xb13   :  { %4083 = vmatpush3.msra.mxu0 %v1400_v63  ;;  %v1807_v63 = vld [vmem:[%s5186_s6 + $0x28] sm:$0xff] }
 0xb14   :  { %v4415_v1 = vpop.eup %4414  ;;  %4085 = vmatmul.mubr.msk.f32.vlgmr.msra.gmra.mrb[14].mxu0 %vm241_vm6, %v1476_v0  ;;  %v4316_v0 = vpack.c.bf16 %v1807_v63, %v1806_v62 }
 0xb15   :  { %v1399_v2 = vmul.f32 %v4415_v1, %v4411_v58  ;;  %v1804_v58 = vld [vmem:[%s5186_s6 + $0x10] sm:$0xff] }
 0xb16   :  { %v4312_v61 = vpack.c.bf16 %v1805_v60, %v1804_v58  ;;  %v3782_v58 = vld [vmem:[%s5183_s3 + $0x30] sm:$0xff] }
 0xb17   :  { %4078 = vmatpush3.msra.mxu1 %v1399_v2 }
 0xb18   :  { %4080 = vmatmul.mubr.msk.f32.vlgmr.msra.gmra.mrb[18].mxu1 %vm241_vm6, %v1402_v3  ;;  %4293 = vmatprep.subr.bf16.mxu1 %v4292_v5 }
 0xb19   :  { %4295 = vmatpush3.bf16.msra.mxu1 %v4292_v5 }
 0xb1a   :  { %4297 = vmatprep.subr.bf16.mxu1 %v4296_v8 }
 0xb1d   :  { %4299 = vmatpush3.bf16.msra.mxu1 %v4296_v8  ;;  %v1702_v8 = vrot.slane %v4637_v43, %v1701_v6 }
 0xb1e   :  { %4309 = vmatprep.subr.bf16.mxu1 %v4308_v59 }
 0xbe7   :  { %v1545_v9 = vpop.f32.mrb[14].mxu0 }
 0xbe8   :  { %1569 = vrot.lane.b32.xlu1 %v1545_v9, %s4504_s21  ;;  %v4086_v10 = vpop.f32.mrb[15].mxu0 }
 0xbeb   :  { %v1471_v12 = vpop.f32.mrb[18].mxu1 }
 0xbec   :  { %1567 = vrot.lane.b32.xlu0 %v1471_v12, %s4504_s21  ;;  %v4081_v13 = vpop.f32.mrb[19].mxu1  ;;  %v1708_v12 = vrot.slane %v4637_v43, %v1707_v7 }
 0xc5a   :  { %v1570_v19 = vpop.permute.xlu1 %1569 }
 0xc5b   :  { %v1580_v27 = vsel %vm1578_vm8, %v1577_v25, %v1570_v19  ;;  %v1808_v19 = vld [vmem:[%s5186_s6 + $0x30] sm:$0xff] }
 0xc5e   :  { %v1568_v23 = vpop.permute.xlu0 %1567 }
 0xc5f   :  { %v1579_v26 = vsel %vm1578_vm8, %v1576_v21, %v1568_v23  ;;  %v4320_v21 = vpack.c.bf16 %v1809_v20, %v1808_v19  ;;  %v1717_v23 = vsub.s32 2, %v4627_v41 }
 0xc60   :  { %4095 = vmatprep.mubr.msk.f32.mxu1 %vm156_vm4, %v1579_v26 }
 0xc61   :  { %4096 = vmatmul.mubr.msk.f32.vlgmr.msra.gmra.mrb[20].mxu1 %vm156_vm4, %v1580_v27  ;;  %v1718_v25 = vrot.slane %v4637_v43, %v1717_v23 }
 0xc62   :  { %4311 = vmatpush3.bf16.msra.mxu1 %v4308_v59  ;;  %v3783_v59 = vld [vmem:[%s5183_s3 + $0x38] sm:$0xff] }
 0xc63   :  { %4313 = vmatprep.subr.bf16.mxu1 %v4312_v61  ;;  %v4328_v60 = vpack.c.bf16 %v3783_v59, %v3782_v58 }
 0xc66   :  { %4315 = vmatpush3.bf16.msra.mxu1 %v4312_v61 }
 0xc67   :  { %4317 = vmatprep.subr.bf16.mxu1 %v4316_v0 }
 0xc6a   :  { %4319 = vmatpush3.bf16.msra.mxu1 %v4316_v0 }
 0xc6b   :  { %4321 = vmatprep.subr.bf16.mxu1 %v4320_v21 }
 0xc6e   :  { %4323 = vmatpush3.bf16.msra.mxu1 %v4320_v21 }
 0xc6f   :  { %4149 = vmatprep.subr.mxu1 %v4489_v11 }
 0xd34   :  { %v4097_v24 = vpop.f32.mrb[20].mxu1 }
 0xd35   :  { %v1667_v29 = vadd.f32 %v4097_v24, %v1588_v28  ;;  %v1661_v30 = vpop.f32.mrb[21].mxu1 }
 0xd36   :  { %v1662_v31 = vadd.f32 %v1661_v30, %v1588_v28 }
 0xd37   :  { %v1671_v32 = vadd.f32 %v1667_v29, %v4621_v40 }
 0xd38   :  { %v1670_v33 = vadd.f32 %v1662_v31, %v4619_v39  ;;  %v1711_v39 = vld [vmem:[%s5185_s5] sm:$0xff]  ;;  %v1812_v31 = vsub.s32 3, %v4627_v41 }
 0xd39   :  { %v1675_v34 = vsel %vm156_vm4, %v1671_v32, 0.0  ;;  %v4300_v53 = vpack.c.bf16 %v1712_v52, %v1711_v39 }
 0xd3a   :  { %1676 = vadd.xlane.f32.xlu1 %v1675_v34  ;;  %v1672_v35 = vsel %vm156_vm4, %v1670_v33, 0.0 }
 0xd3b   :  { %1673 = vadd.xlane.f32.xlu0 %v1672_v35  ;;  %4301 = vmatprep.subr.bf16.mxu0 %v4300_v53 }
 0xd3c   :  { %4303 = vmatpush3.bf16.msra.mxu0 %v4300_v53 }
 0xd3d   :  { %4305 = vmatprep.subr.bf16.mxu0 %v4304_v56 }
 0xd40   :  { %4307 = vmatpush3.bf16.msra.mxu0 %v4304_v56  ;;  %v3780_v56 = vld [vmem:[%s5183_s3 + $0x20] sm:$0xff] }
 0xd41   :  { %v4324_v47 = vpack.c.bf16 %v3781_v57, %v3780_v56 }
 0xd43   :  { %4325 = vmatprep.subr.bf16.mxu0 %v4324_v47 }
 0xdc7   :  { %v1677_v36 = vpop.xlane.xlu1 %1676 }
 0xdc8   :  { %v1680_v37 = vmul.f32 0.03125, %v1677_v36  ;;  %v1674_v38 = vpop.xlane.xlu0 %1673 }
 0xdc9   :  { %v1679_v44 = vmul.f32 0.03125, %v1674_v38 }
 0xdca   :  { %v1682_v45 = vsub.f32 %v1671_v32, %v1680_v37  ;;  %v1813_v32 = vrot.slane %v4637_v43, %v1812_v31 }
 0xdcb   :  { %v1681_v46 = vsub.f32 %v1670_v33, %v1679_v44 }
 0xdcc   :  { %v1684_v51 = vmul.f32 %v1682_v45, %v1682_v45 }
 0xdcd   :  { %v1683_v49 = vmul.f32 %v1681_v46, %v1681_v46 }
 0xdce   :  { %v1688_v40 = vsel %vm156_vm4, %v1684_v51, 0.0 }
 0xdcf   :  { %v1685_v50 = vsel %vm156_vm4, %v1683_v49, 0.0 }
 0xdd0   :  { %1686 = vadd.xlane.f32.xlu0 %v1685_v50 }
 0xdd4   :  { %1689 = vadd.xlane.f32.xlu0 %v1688_v40 }
 0xe5d   :  { %v1687_v1 = vpop.xlane.xlu0 %1686 }
 0xe5e   :  { %v1691_v2 = vmul.f32 0.03125, %v1687_v1 }
 0xe60   :  { %v1693_v3 = vadd.f32 1e-12, %v1691_v2 }
 0xe61   :  { %v1690_v48 = vpop.xlane.xlu0 %1689 }
 0xe62   :  { %4416 = vrsqrt.f32 %v1693_v3  ;;  %v1692_v4 = vmul.f32 0.03125, %v1690_v48  ;;  %v1926_v3 = vsub.s32 6, %v4627_v41  ;;  %v1932_v48 = vsub.s32 7, %v4627_v41 }
 0xe64   :  { %v1694_v5 = vadd.f32 1e-12, %v1692_v4  ;;  %v1927_v4 = vrot.slane %v4637_v43, %v1926_v3 }
 0xe66   :  { %4418 = vrsqrt.f32 %v1694_v5 }
 0xe6c   :  { %v4417_v9 = vpop.eup %4416 }
 0xe6d   :  { %v1697_v10 = vmul.f32 %v4417_v9, %v1681_v46 }
 0xe6f   :  { %v1703_v13 = vmul.f32 %v1702_v8, %v1697_v10 }
 0xe70   :  { %v4419_v14 = vpop.eup %4418 }
 0xe71   :  { %v1698_v15 = vmul.f32 %v4419_v14, %v1682_v45  ;;  %v1709_v16 = vadd.f32 %v1708_v12, %v1703_v13 }
 0xe73   :  { %v1704_v17 = vmul.f32 %v1702_v8, %v1698_v15  ;;  %4106 = vmatprep.mubr.msk.f32.mxu0 %vm156_vm4, %v1709_v16 }
 0xe75   :  { %v1710_v18 = vadd.f32 %v1708_v12, %v1704_v17  ;;  %v1933_v12 = vrot.slane %v4637_v43, %v1932_v48  ;;  %v4919_v17 = vld [vmem:[%s5187_s7 + $0x8] sm:$0xff] }
 0xe76   :  { %v1946_v43 = vrot.slane %v4919_v17, %v154_v42 }
 0xe77   :  { %4107 = vmatmul.mubr.msk.f32.vlgmr.msra.gmra.mrb[16].mxu0 %vm156_vm4, %v1710_v18 }
 0xe78   :  { %4327 = vmatpush3.bf16.msra.mxu0 %v4324_v47 }
 0xe79   :  { %4329 = vmatprep.subr.bf16.mxu0 %v4328_v60 }
 0xe7c   :  { %4331 = vmatpush3.bf16.msra.mxu0 %v4328_v60 }
 0xe7d   :  { %4139 = vmatprep.subr.mxu0 %v4489_v11 }
 0xf4a   :  { %v4108_v26 = vpop.f32.mrb[16].mxu0 }
 0xf4b   :  { %v1797_v27 = vadd.f32 %v4108_v26, %v1718_v25  ;;  %v1791_v28 = vpop.f32.mrb[17].mxu0 }
 0xf4c   :  { %v1792_v24 = vadd.f32 %v1791_v28, %v1718_v25 }
 0xf4d   :  { %v1801_v30 = vmax.f32 %v1797_v27, 0.0 }
 0xf4e   :  { %v1800_v29 = vmax.f32 %v1792_v24, 0.0 }
 0xf50   :  { %4125 = vmatprep.mubr.msk.f32.mxu1 %vm1814_vm9, %v1800_v29 }
 0xf51   :  { %4126 = vmatmul.mubr.msk.f32.vlgmr.msra.gmra.mrb[22].mxu1 %vm1814_vm9, %v1801_v30 }
 0xf52   :  { %4151 = vmatprep.mubr.msk.f32.mxu1 %vm4490_vm5, %v4489_v11 }
0x1024   :  { %v4127_v33 = vpop.f32.mrb[22].mxu1 }
0x1025   :  { %v1893_v34 = vadd.f32 %v4127_v33, %v1813_v32  ;;  %v1887_v35 = vpop.f32.mrb[23].mxu1 }
0x1026   :  { %v1888_v36 = vadd.f32 %v1887_v35, %v1813_v32 }
0x1027   :  { %v1897_v37 = vadd.f32 %v1893_v34, %v1710_v18 }
0x1028   :  { %v1896_v38 = vadd.f32 %v1888_v36, %v1709_v16 }
0x1029   :  { %v1901_v44 = vsel %vm156_vm4, %v1897_v37, 0.0 }
0x102a   :  { %1902 = vadd.xlane.f32.xlu0 %v1901_v44  ;;  %v1898_v45 = vsel %vm156_vm4, %v1896_v38, 0.0 }
0x102b   :  { %1899 = vadd.xlane.f32.xlu1 %v1898_v45 }
0x10b7   :  { %v1903_v46 = vpop.xlane.xlu0 %1902 }
0x10b8   :  { %v1905_v49 = vmul.f32 0.03125, %v1903_v46  ;;  %v1900_v50 = vpop.xlane.xlu1 %1899 }
0x10b9   :  { %v1904_v51 = vmul.f32 0.03125, %v1900_v50 }
0x10ba   :  { %v1907_v40 = vsub.f32 %v1897_v37, %v1905_v49 }
0x10bb   :  { %v1906_v39 = vsub.f32 %v1896_v38, %v1904_v51 }
0x10bc   :  { %v1909_v52 = vmul.f32 %v1907_v40, %v1907_v40 }
0x10bd   :  { %v1908_v53 = vmul.f32 %v1906_v39, %v1906_v39 }
0x10be   :  { %v1913_v54 = vsel %vm156_vm4, %v1909_v52, 0.0 }
0x10bf   :  { %1914 = vadd.xlane.f32.xlu0 %v1913_v54  ;;  %v1910_v55 = vsel %vm156_vm4, %v1908_v53, 0.0 }
0x10c0   :  { %1911 = vadd.xlane.f32.xlu1 %v1910_v55 }
0x114c   :  { %v1915_v61 = vpop.xlane.xlu0 %1914 }
0x114d   :  { %v1917_v62 = vmul.f32 0.03125, %v1915_v61  ;;  %v1912_v63 = vpop.xlane.xlu1 %1911 }
0x114e   :  { %v1916_v0 = vmul.f32 0.03125, %v1912_v63 }
0x114f   :  { %v1919_v1 = vadd.f32 1e-12, %v1917_v62 }
0x1150   :  { %v1918_v2 = vadd.f32 1e-12, %v1916_v0 }
0x1151   :  { %4420 = vrsqrt.f32 %v1919_v1 }
0x1152   :  { %4422 = vrsqrt.f32 %v1918_v2 }
0x115b   :  { %v4421_v5 = vpop.eup %4420 }
0x115c   :  { %v4423_v8 = vpop.eup %4422  ;;  %v1923_v9 = vmul.f32 %v4421_v5, %v1907_v40 }
0x115d   :  { %v1922_v10 = vmul.f32 %v4423_v8, %v1906_v39 }
0x115e   :  { %v1929_v13 = vmul.f32 %v1927_v4, %v1923_v9 }
0x115f   :  { %v1928_v14 = vmul.f32 %v1927_v4, %v1922_v10 }
0x1160   :  { %v4908_v16 = vadd.f32 %v1933_v12, %v1929_v13 }
0x1161   :  { %v4906_v15 = vadd.f32 %v1933_v12, %v1928_v14 }
0x1163   :  { %4136 = vmatprep.mubr.msk.f32.mxu0 %vm156_vm4, %v4906_v15 }
0x1164   :  { %4137 = vmatmul.mubr.msk.f32.vlgmr.msra.gmra.mrb[18].mxu0 %vm156_vm4, %v4908_v16 }
0x1165   :  { %4141 = vmatprep.mubr.msk.f32.mxu0 %vm4490_vm5, %v4489_v11 }
0x1237   :  { %v4138_v18 = vpop.f32.mrb[18].mxu0 }
0x1238   :  { %v4924_v19 = vadd.f32 %v4138_v18, %v1946_v43  ;;  %v2019_v20 = vpop.f32.mrb[19].mxu0 }
0x1239   :  { %v4926_v21 = vadd.f32 %v2019_v20, %v1946_v43 }
0x123a   :  { %2106 = vrot.lane.b32.xlu0 %v4924_v19, %s4491_s23 }
0x123b   :  { %2029 = vrot.lane.b32.xlu1 %v4926_v21, %s4491_s23 }
0x12ac   :  { %v2107_v26 = vpop.permute.xlu0 %2106 }
0x12ad   :  { %v2030_v25 = vpop.permute.xlu1 %2029 }
0x12ae   :  { %4140 = vmatpush3.xpose.msk.msra.mxu0 %vm241_vm6, %v2030_v25 }
0x12af   :  { %4144 = vmatprep.subr.mxu0 %v4489_v11 }
0x12b1   :  { %4142 = vmatmul.mubr.msk.f32.vlgmr.msra.gmra.mrb[20].mxu0 %vm241_vm6, %v4926_v21 }
0x12b2   :  { %4145 = vmatpush3.xpose.msk.msra.mxu0 %vm241_vm6, %v2107_v26  ;;  %4146 = vmatprep.mubr.msk.f32.mxu0 %vm4490_vm5, %v4489_v11 }
0x12b3   :  { %4154 = vmatprep.subr.mxu0 %v4489_v11 }
0x12b5   :  { %4147 = vmatmul.mubr.msk.f32.vlgmr.msra.gmra.mrb[22].mxu0 %vm241_vm6, %v4924_v19 }
0x12b6   :  { %4156 = vmatprep.mubr.msk.f32.mxu0 %vm4490_vm5, %v4489_v11 }
0x1384   :  { %v2101_v42 = vpop.f32.mrb[20].mxu0 }
0x1385   :  { %v2182_v27 = vmul.f32 0.35355338, %v2101_v42  ;;  %v4143_v28 = vpop.f32.mrb[21].mxu0 }
0x1387   :  { %v2184_v24 = vsel %vm241_vm6, %v2182_v27, -inf }
0x1388   :  { %2185 = vmax.xlane.f32.xlu1 %v2184_v24  ;;  %v2178_v29 = vpop.f32.mrb[22].mxu0 }
0x1389   :  { %v2183_v30 = vmul.f32 0.35355338, %v2178_v29  ;;  %v4148_v32 = vpop.f32.mrb[23].mxu0 }
0x138b   :  { %v2187_v33 = vsel %vm241_vm6, %v2183_v30, -inf }
0x138c   :  { %2188 = vmax.xlane.f32.xlu0 %v2187_v33 }
0x1415   :  { %v2186_v34 = vpop.xlane.xlu1 %2185 }
0x1416   :  { %v2190_v35 = vsub.f32 %v2182_v27, %v2186_v34 }
0x1418   :  { %v2192_v36 = vmul.f32 1.442695, %v2190_v35 }
0x1419   :  { %v2189_v37 = vpop.xlane.xlu0 %2188 }
0x141a   :  { %4424 = vpow2.f32 %v2192_v36  ;;  %v2191_v38 = vsub.f32 %v2183_v30, %v2189_v37 }
0x141c   :  { %v2194_v44 = vmul.f32 1.442695, %v2191_v38 }
0x141e   :  { %4426 = vpow2.f32 %v2194_v44 }
0x1424   :  { %v4425_v45 = vpop.eup %4424 }
0x1425   :  { %v2196_v46 = vsel %vm241_vm6, %v4425_v45, 0.0 }
0x1426   :  { %2197 = vadd.xlane.f32.xlu1 %v2196_v46 }
0x1428   :  { %v4427_v49 = vpop.eup %4426 }
0x1429   :  { %v2199_v50 = vsel %vm241_vm6, %v4427_v49, 0.0 }
0x142a   :  { %2200 = vadd.xlane.f32.xlu0 %v2199_v50 }
0x1437   :  { %2206 = vrot.lane.b32.xlu1 %v4926_v21, %s4492_s24 }
0x143b   :  { %2356 = vrot.lane.b32.xlu1 %v4926_v21, %s4493_s25 }
0x143f   :  { %2434 = vrot.lane.b32.xlu1 %v4924_v19, %s4493_s25 }
0x1440   :  { %2280 = vrot.lane.b32.xlu0 %v4924_v19, %s4492_s24 }
0x1443   :  { %2432 = vrot.lane.b32.xlu1 %v4924_v19, %s4494_s26 }
0x1444   :  { %2354 = vrot.lane.b32.xlu0 %v4926_v21, %s4494_s26 }
0x14b3   :  { %v2198_v51 = vpop.xlane.xlu1 %2197 }
0x14b4   :  { %4428 = vrcp.f32 %v2198_v51 }
0x14b7   :  { %v2201_v40 = vpop.xlane.xlu0 %2200  ;;  %v2207_v39 = vpop.permute.xlu1 %2206 }
0x14b8   :  { %4430 = vrcp.f32 %v2201_v40 }
0x14bb   :  { %v2357_v55 = vpop.permute.xlu1 %2356  ;;  %v2281_v57 = vpop.permute.xlu0 %2280 }
0x14be   :  { %v4429_v52 = vpop.eup %4428 }
0x14bf   :  { %v2204_v53 = vmul.f32 %v4429_v52, %v4425_v45  ;;  %v2435_v47 = vpop.permute.xlu1 %2434  ;;  %v2355_v58 = vpop.permute.xlu0 %2354 }
0x14c1   :  { %4150 = vmatpush3.msra.mxu1 %v2204_v53 }
0x14c2   :  { %v4431_v54 = vpop.eup %4430  ;;  %4152 = vmatmul.mubr.msk.f32.vlgmr.msra.gmra.mrb[24].mxu1 %vm241_vm6, %v2207_v39  ;;  %4159 = vmatprep.subr.mxu1 %v4489_v11 }
0x14c3   :  { %v2205_v56 = vmul.f32 %v4431_v54, %v4427_v49  ;;  %4161 = vmatprep.mubr.msk.f32.mxu1 %vm4490_vm5, %v4489_v11  ;;  %v2433_v59 = vpop.permute.xlu1 %2432 }
0x14c5   :  { %4155 = vmatpush3.msra.mxu0 %v2205_v56 }
0x14c6   :  { %4157 = vmatmul.mubr.msk.f32.vlgmr.msra.gmra.mrb[24].mxu0 %vm241_vm6, %v2281_v57  ;;  %4164 = vmatprep.subr.mxu0 %v4489_v11 }
0x14c7   :  { %4166 = vmatprep.mubr.msk.f32.mxu0 %vm4490_vm5, %v4489_v11 }
0x14c8   :  { %4160 = vmatpush3.xpose.msk.msra.mxu1 %vm241_vm6, %v2357_v55 }
0x14c9   :  { %4169 = vmatprep.subr.mxu1 %v4489_v11 }
0x14cb   :  { %4162 = vmatmul.mubr.msk.f32.vlgmr.msra.gmra.mrb[26].mxu1 %vm241_vm6, %v2355_v58 }
0x14cc   :  { %4165 = vmatpush3.xpose.msk.msra.mxu0 %vm241_vm6, %v2435_v47  ;;  %4171 = vmatprep.mubr.msk.f32.mxu1 %vm4490_vm5, %v4489_v11 }
0x14cd   :  { %4174 = vmatprep.subr.mxu0 %v4489_v11 }
0x14cf   :  { %4167 = vmatmul.mubr.msk.f32.vlgmr.msra.gmra.mrb[26].mxu0 %vm241_vm6, %v2433_v59 }
0x14d0   :  { %4176 = vmatprep.mubr.msk.f32.mxu0 %vm4490_vm5, %v4489_v11 }
0x1595   :  { %v4978_v60 = vpop.f32.mrb[24].mxu1 }
0x1596   :  { %v4153_v61 = vpop.f32.mrb[25].mxu1 }
0x1599   :  { %v4980_v62 = vpop.f32.mrb[24].mxu0 }
0x159a   :  { %v4158_v63 = vpop.f32.mrb[25].mxu0 }
0x159e   :  { %v2428_v0 = vpop.f32.mrb[26].mxu1 }
0x159f   :  { %v2510_v1 = vmul.f32 0.35355338, %v2428_v0  ;;  %v4163_v2 = vpop.f32.mrb[27].mxu1 }
0x15a1   :  { %v2512_v4 = vsel %vm241_vm6, %v2510_v1, -inf }
0x15a2   :  { %2513 = vmax.xlane.f32.xlu0 %v2512_v4  ;;  %v2506_v5 = vpop.f32.mrb[26].mxu0 }
0x15a3   :  { %v2511_v8 = vmul.f32 0.35355338, %v2506_v5  ;;  %v4168_v9 = vpop.f32.mrb[27].mxu0 }
0x15a5   :  { %v2515_v10 = vsel %vm241_vm6, %v2511_v8, -inf }
0x15a6   :  { %2516 = vmax.xlane.f32.xlu1 %v2515_v10 }
0x15b7   :  { %2534 = vrot.lane.b32.xlu1 %v4926_v21, %s4495_s27 }
0x15bb   :  { %2684 = vrot.lane.b32.xlu1 %v4926_v21, %s4496_s28 }
0x15bf   :  { %2762 = vrot.lane.b32.xlu1 %v4924_v19, %s4496_s28 }
0x15c3   :  { %2760 = vrot.lane.b32.xlu1 %v4924_v19, %s4497_s29 }
0x162f   :  { %v2514_v12 = vpop.xlane.xlu0 %2513 }
0x1630   :  { %v2518_v13 = vsub.f32 %v2510_v1, %v2514_v12 }
0x1632   :  { %v2520_v14 = vmul.f32 1.442695, %v2518_v13 }
0x1633   :  { %v2517_v43 = vpop.xlane.xlu1 %2516 }
0x1634   :  { %4432 = vpow2.f32 %v2520_v14  ;;  %v2519_v18 = vsub.f32 %v2511_v8, %v2517_v43 }
0x1636   :  { %v2522_v20 = vmul.f32 1.442695, %v2519_v18 }
0x1637   :  { %v2535_v29 = vpop.permute.xlu1 %2534 }
0x1638   :  { %4434 = vpow2.f32 %v2522_v20 }
0x163b   :  { %v2685_v34 = vpop.permute.xlu1 %2684 }
0x163e   :  { %v4433_v25 = vpop.eup %4432 }
0x163f   :  { %v2524_v26 = vsel %vm241_vm6, %v4433_v25, 0.0  ;;  %v2763_v37 = vpop.permute.xlu1 %2762 }
0x1640   :  { %2525 = vadd.xlane.f32.xlu0 %v2524_v26 }
0x1642   :  { %v4435_v42 = vpop.eup %4434 }
0x1643   :  { %v2527_v27 = vsel %vm241_vm6, %v4435_v42, 0.0  ;;  %v2761_v44 = vpop.permute.xlu1 %2760 }
0x1644   :  { %2528 = vadd.xlane.f32.xlu0 %v2527_v27 }
0x165a   :  { %2608 = vrot.lane.b32.xlu0 %v4924_v19, %s4495_s27 }
0x165e   :  { %2682 = vrot.lane.b32.xlu0 %v4926_v21, %s4497_s29 }
0x16cd   :  { %v2526_v28 = vpop.xlane.xlu0 %2525 }
0x16ce   :  { %4436 = vrcp.f32 %v2526_v28 }
0x16d1   :  { %v2529_v24 = vpop.xlane.xlu0 %2528 }
0x16d2   :  { %4438 = vrcp.f32 %v2529_v24 }
0x16d5   :  { %v2609_v36 = vpop.permute.xlu0 %2608 }
0x16d8   :  { %v4437_v30 = vpop.eup %4436 }
0x16d9   :  { %v2532_v32 = vmul.f32 %v4437_v30, %v4433_v25  ;;  %v2683_v38 = vpop.permute.xlu0 %2682 }
0x16db   :  { %4170 = vmatpush3.msra.mxu1 %v2532_v32 }
0x16dc   :  { %v4439_v33 = vpop.eup %4438  ;;  %4172 = vmatmul.mubr.msk.f32.vlgmr.msra.gmra.mrb[28].mxu1 %vm241_vm6, %v2535_v29  ;;  %4179 = vmatprep.subr.mxu1 %v4489_v11 }
0x16dd   :  { %v2533_v35 = vmul.f32 %v4439_v33, %v4435_v42  ;;  %4181 = vmatprep.mubr.msk.f32.mxu1 %vm4490_vm5, %v4489_v11 }
0x16df   :  { %4175 = vmatpush3.msra.mxu0 %v2533_v35 }
0x16e0   :  { %4177 = vmatmul.mubr.msk.f32.vlgmr.msra.gmra.mrb[28].mxu0 %vm241_vm6, %v2609_v36  ;;  %4184 = vmatprep.subr.mxu0 %v4489_v11 }
0x16e1   :  { %4186 = vmatprep.mubr.msk.f32.mxu0 %vm4490_vm5, %v4489_v11 }
0x16e2   :  { %4180 = vmatpush3.xpose.msk.msra.mxu1 %vm241_vm6, %v2685_v34 }
0x16e3   :  { %4189 = vmatprep.subr.mxu1 %v4489_v11 }
0x16e5   :  { %4182 = vmatmul.mubr.msk.f32.vlgmr.msra.gmra.mrb[30].mxu1 %vm241_vm6, %v2683_v38 }
0x16e6   :  { %4185 = vmatpush3.xpose.msk.msra.mxu0 %vm241_vm6, %v2763_v37  ;;  %4191 = vmatprep.mubr.msk.f32.mxu1 %vm4490_vm5, %v4489_v11 }
0x16e7   :  { %4194 = vmatprep.subr.mxu0 %v4489_v11 }
0x16e9   :  { %4187 = vmatmul.mubr.msk.f32.vlgmr.msra.gmra.mrb[30].mxu0 %vm241_vm6, %v2761_v44 }
0x16ea   :  { %4196 = vmatprep.mubr.msk.f32.mxu0 %vm4490_vm5, %v4489_v11 }
0x17af   :  { %v5016_v45 = vpop.f32.mrb[28].mxu1 }
0x17b0   :  { %v4173_v46 = vpop.f32.mrb[29].mxu1 }
0x17b3   :  { %v5018_v49 = vpop.f32.mrb[28].mxu0 }
0x17b4   :  { %v4178_v50 = vpop.f32.mrb[29].mxu0 }
0x17b8   :  { %v2756_v51 = vpop.f32.mrb[30].mxu1 }
0x17b9   :  { %v2838_v40 = vmul.f32 0.35355338, %v2756_v51  ;;  %v4183_v39 = vpop.f32.mrb[31].mxu1 }
0x17bb   :  { %v2840_v52 = vsel %vm241_vm6, %v2838_v40, -inf }
0x17bc   :  { %2841 = vmax.xlane.f32.xlu0 %v2840_v52  ;;  %v2834_v53 = vpop.f32.mrb[30].mxu0 }
0x17bd   :  { %v2839_v54 = vmul.f32 0.35355338, %v2834_v53  ;;  %v4188_v55 = vpop.f32.mrb[31].mxu0 }
0x17bf   :  { %v2843_v56 = vsel %vm241_vm6, %v2839_v54, -inf }
0x17c0   :  { %2844 = vmax.xlane.f32.xlu1 %v2843_v56 }
0x17d1   :  { %2862 = vrot.lane.b32.xlu1 %v4926_v21, %s4498_s30 }
0x17d5   :  { %3012 = vrot.lane.b32.xlu1 %v4926_v21, %s4499_s9 }
0x17d9   :  { %3090 = vrot.lane.b32.xlu1 %v4924_v19, %s4499_s9 }
0x17dd   :  { %3088 = vrot.lane.b32.xlu1 %v4924_v19, %s4500_s10 }
0x1849   :  { %v2842_v57 = vpop.xlane.xlu0 %2841 }
0x184a   :  { %v2846_v47 = vsub.f32 %v2838_v40, %v2842_v57 }
0x184c   :  { %v2848_v58 = vmul.f32 1.442695, %v2846_v47 }
0x184d   :  { %v2845_v59 = vpop.xlane.xlu1 %2844 }
0x184e   :  { %4440 = vpow2.f32 %v2848_v58  ;;  %v2847_v61 = vsub.f32 %v2839_v54, %v2845_v59  ;;  %v3811_v58 = vld [vmem:[%s5184_s4 + $0x28] sm:$0xff] }
0x1850   :  { %v2850_v63 = vmul.f32 1.442695, %v2847_v61  ;;  %v3812_v61 = vld [vmem:[%s5184_s4 + $0x30] sm:$0xff] }
0x1851   :  { %v2863_v9 = vpop.permute.xlu1 %2862 }
0x1852   :  { %4442 = vpow2.f32 %v2850_v63  ;;  %v3813_v63 = vld [vmem:[%s5184_s4 + $0x38] sm:$0xff] }
0x1855   :  { %v3013_v14 = vpop.permute.xlu1 %3012 }
0x1858   :  { %v4441_v0 = vpop.eup %4440 }
0x1859   :  { %v2852_v1 = vsel %vm241_vm6, %v4441_v0, 0.0  ;;  %v3091_v20 = vpop.permute.xlu1 %3090 }
0x185a   :  { %2853 = vadd.xlane.f32.xlu0 %v2852_v1 }
0x185c   :  { %v4443_v2 = vpop.eup %4442 }
0x185d   :  { %v2855_v4 = vsel %vm241_vm6, %v4443_v2, 0.0  ;;  %v3089_v26 = vpop.permute.xlu1 %3088 }
0x185e   :  { %2856 = vadd.xlane.f32.xlu0 %v2855_v4 }
0x1874   :  { %2936 = vrot.lane.b32.xlu0 %v4924_v19, %s4498_s30 }
0x1878   :  { %3010 = vrot.lane.b32.xlu0 %v4926_v21, %s4500_s10 }
0x18e7   :  { %v2854_v5 = vpop.xlane.xlu0 %2853 }
0x18e8   :  { %4444 = vrcp.f32 %v2854_v5 }
0x18eb   :  { %v2857_v8 = vpop.xlane.xlu0 %2856 }
0x18ec   :  { %4446 = vrcp.f32 %v2857_v8 }
0x18ef   :  { %v2937_v18 = vpop.permute.xlu0 %2936 }
0x18f2   :  { %v4445_v10 = vpop.eup %4444 }
0x18f3   :  { %v2860_v12 = vmul.f32 %v4445_v10, %v4441_v0  ;;  %v3011_v25 = vpop.permute.xlu0 %3010  ;;  %v4336_v0 = vpack.c.bf16 %v3813_v63, %v3812_v61 }
0x18f5   :  { %4190 = vmatpush3.msra.mxu1 %v2860_v12 }
0x18f6   :  { %v4447_v13 = vpop.eup %4446  ;;  %4192 = vmatmul.mubr.msk.f32.vlgmr.msra.gmra.mrb[32].mxu1 %vm241_vm6, %v2863_v9  ;;  %4199 = vmatprep.subr.mxu1 %v4489_v11 }
0x18f7   :  { %v2861_v43 = vmul.f32 %v4447_v13, %v4443_v2  ;;  %4201 = vmatprep.mubr.msk.f32.mxu1 %vm4490_vm5, %v4489_v11 }
0x18f9   :  { %4195 = vmatpush3.msra.mxu0 %v2861_v43 }
0x18fa   :  { %4197 = vmatmul.mubr.msk.f32.vlgmr.msra.gmra.mrb[32].mxu0 %vm241_vm6, %v2937_v18  ;;  %4204 = vmatprep.subr.mxu0 %v4489_v11 }
0x18fb   :  { %4206 = vmatprep.mubr.msk.f32.mxu0 %vm4490_vm5, %v4489_v11 }
0x18fc   :  { %4200 = vmatpush3.xpose.msk.msra.mxu1 %vm241_vm6, %v3013_v14 }
0x18fd   :  { %4209 = vmatprep.subr.mxu1 %v4489_v11 }
0x18ff   :  { %4202 = vmatmul.mubr.msk.f32.vlgmr.msra.gmra.mrb[34].mxu1 %vm241_vm6, %v3011_v25 }
0x1900   :  { %4205 = vmatpush3.xpose.msk.msra.mxu0 %vm241_vm6, %v3091_v20  ;;  %4211 = vmatprep.mubr.msk.f32.mxu1 %vm4490_vm5, %v4489_v11 }
0x1901   :  { %4214 = vmatprep.subr.mxu0 %v4489_v11 }
0x1903   :  { %4207 = vmatmul.mubr.msk.f32.vlgmr.msra.gmra.mrb[34].mxu0 %vm241_vm6, %v3089_v26 }
0x1904   :  { %4216 = vmatprep.mubr.msk.f32.mxu0 %vm4490_vm5, %v4489_v11 }
0x19c9   :  { %v2932_v42 = vpop.f32.mrb[32].mxu1 }
0x19ca   :  { %v4193_v27 = vpop.f32.mrb[33].mxu1 }
0x19cd   :  { %v3006_v28 = vpop.f32.mrb[32].mxu0 }
0x19ce   :  { %v4198_v24 = vpop.f32.mrb[33].mxu0 }
0x19d2   :  { %v3084_v29 = vpop.f32.mrb[34].mxu1 }
0x19d3   :  { %v3166_v30 = vmul.f32 0.35355338, %v3084_v29  ;;  %v4203_v32 = vpop.f32.mrb[35].mxu1 }
0x19d5   :  { %v3168_v33 = vsel %vm241_vm6, %v3166_v30, -inf }
0x19d6   :  { %3169 = vmax.xlane.f32.xlu0 %v3168_v33  ;;  %v3162_v34 = vpop.f32.mrb[34].mxu0 }
0x19d7   :  { %v3167_v35 = vmul.f32 0.35355338, %v3162_v34  ;;  %v4208_v36 = vpop.f32.mrb[35].mxu0 }
0x19d9   :  { %v3171_v37 = vsel %vm241_vm6, %v3167_v35, -inf }
0x19da   :  { %3172 = vmax.xlane.f32.xlu1 %v3171_v37 }
0x19eb   :  { %3190 = vrot.lane.b32.xlu1 %v4926_v21, %s4501_s11 }
0x19ef   :  { %3340 = vrot.lane.b32.xlu1 %v5016_v45, %s4502_s12 }
0x19f3   :  { %3342 = vrot.lane.b32.xlu1 %v5018_v49, %s4502_s12 }
0x19f7   :  { %3350 = vrot.lane.b32.xlu1 %v3006_v28, %s4503_s13 }
0x1a63   :  { %v3170_v11 = vpop.xlane.xlu0 %3169 }
0x1a64   :  { %v3174_v38 = vsub.f32 %v3166_v30, %v3170_v11 }
0x1a66   :  { %v3176_v44 = vmul.f32 1.442695, %v3174_v38 }
0x1a67   :  { %v3173_v46 = vpop.xlane.xlu1 %3172 }
0x1a68   :  { %4448 = vpow2.f32 %v3176_v44  ;;  %v3175_v50 = vsub.f32 %v3167_v35, %v3173_v46 }
0x1a6a   :  { %v3178_v51 = vmul.f32 1.442695, %v3175_v50  ;;  %v3817_v50 = vld [vmem:[%s5185_s5 + $0x28] sm:$0xff] }
0x1a6b   :  { %v3191_v55 = vpop.permute.xlu1 %3190 }
0x1a6c   :  { %4450 = vpow2.f32 %v3178_v51 }
0x1a6f   :  { %v3341_v8 = vpop.permute.xlu1 %3340 }
0x1a70   :  { %v3362_v12 = vsel %vm241_vm6, %v4978_v60, %v3341_v8  ;;  %v3376_v60 = vrot.slane %v4919_v17, %v1587_v22 }
0x1a72   :  { %v4449_v40 = vpop.eup %4448 }
0x1a73   :  { %v3180_v39 = vsel %vm241_vm6, %v4449_v40, 0.0  ;;  %v3343_v9 = vpop.permute.xlu1 %3342 }
0x1a74   :  { %3181 = vadd.xlane.f32.xlu0 %v3180_v39  ;;  %v3363_v20 = vsel %vm241_vm6, %v4980_v62, %v3343_v9  ;;  %v3819_v39 = vld [vmem:[%s5185_s5 + $0x38] sm:$0xff] }
0x1a76   :  { %v4451_v21 = vpop.eup %4450 }
0x1a77   :  { %v3183_v45 = vsel %vm241_vm6, %v4451_v21, 0.0  ;;  %v3351_v13 = vpop.permute.xlu1 %3350 }
0x1a78   :  { %3184 = vadd.xlane.f32.xlu0 %v3183_v45  ;;  %v3365_v25 = vsel %vm1575_vm7, %v3363_v20, %v3351_v13  ;;  %v3822_v45 = vld [vmem:[%s5186_s6 + $0x40] sm:$0xff] }
0x1a8e   :  { %3264 = vrot.lane.b32.xlu0 %v4924_v19, %s4501_s11  ;;  %v3810_v19 = vld [vmem:[%s5184_s4 + $0x20] sm:$0xff] }
0x1a8f   :  { %v4332_v59 = vpack.c.bf16 %v3811_v58, %v3810_v19 }
0x1a92   :  { %3348 = vrot.lane.b32.xlu0 %v2932_v42, %s4503_s13 }
0x1b01   :  { %v3182_v49 = vpop.xlane.xlu0 %3181 }
0x1b02   :  { %4452 = vrcp.f32 %v3182_v49  ;;  %v3823_v49 = vld [vmem:[%s5186_s6 + $0x48] sm:$0xff] }
0x1b05   :  { %v3185_v52 = vpop.xlane.xlu0 %3184 }
0x1b06   :  { %4454 = vrcp.f32 %v3185_v52  ;;  %v3824_v52 = vld [vmem:[%s5186_s6 + $0x50] sm:$0xff] }
0x1b09   :  { %v3265_v47 = vpop.permute.xlu0 %3264 }
0x1b0c   :  { %v4453_v53 = vpop.eup %4452 }
0x1b0d   :  { %v3188_v54 = vmul.f32 %v4453_v53, %v4449_v40  ;;  %v3349_v10 = vpop.permute.xlu0 %3348  ;;  %v3818_v40 = vld [vmem:[%s5185_s5 + $0x30] sm:$0xff]  ;;  %v4348_v53 = vpack.c.bf16 %v3823_v49, %v3822_v45  ;;  %v3715_v45 = vrot.slane %v4919_v17, %v1926_v3 }
0x1b0e   :  { %v3364_v14 = vsel %vm1575_vm7, %v3362_v12, %v3349_v10 }
0x1b0f   :  { %4210 = vmatpush3.msra.mxu1 %v3188_v54  ;;  %v3825_v54 = vld [vmem:[%s5186_s6 + $0x58] sm:$0xff] }
0x1b10   :  { %v4455_v56 = vpop.eup %4454  ;;  %4212 = vmatmul.mubr.msk.f32.vlgmr.msra.gmra.mrb[36].mxu1 %vm241_vm6, %v3191_v55  ;;  %4333 = vmatprep.subr.bf16.mxu1 %v4332_v59  ;;  %v4352_v55 = vpack.c.bf16 %v3825_v54, %v3824_v52  ;;  %v3721_v54 = vrot.slane %v4919_v17, %v1932_v48 }
0x1b11   :  { %v3189_v57 = vmul.f32 %v4455_v56, %v4451_v21  ;;  %4335 = vmatpush3.bf16.msra.mxu1 %v4332_v59  ;;  %v4344_v21 = vpack.c.bf16 %v3819_v39, %v3818_v40  ;;  %v3826_v56 = vld [vmem:[%s5186_s6 + $0x60] sm:$0xff] }
0x1b12   :  { %4337 = vmatprep.subr.bf16.mxu1 %v4336_v0 }
0x1b13   :  { %4215 = vmatpush3.msra.mxu0 %v3189_v57  ;;  %v3827_v57 = vld [vmem:[%s5186_s6 + $0x68] sm:$0xff] }
0x1b14   :  { %4217 = vmatmul.mubr.msk.f32.vlgmr.msra.gmra.mrb[36].mxu0 %vm241_vm6, %v3265_v47  ;;  %v4356_v47 = vpack.c.bf16 %v3827_v57, %v3826_v56 }
0x1b15   :  { %4339 = vmatpush3.bf16.msra.mxu1 %v4336_v0 }
0x1b16   :  { %4349 = vmatprep.subr.bf16.mxu1 %v4348_v53 }
0x1be3   :  { %v3260_v1 = vpop.f32.mrb[36].mxu1 }
0x1be4   :  { %3356 = vrot.lane.b32.xlu0 %v3260_v1, %s4504_s21  ;;  %v4213_v2 = vpop.f32.mrb[37].mxu1  ;;  %v3489_v1 = vrot.slane %v4919_v17, %v1701_v6  ;;  %v3828_v6 = vld [vmem:[%s5186_s6 + $0x70] sm:$0xff] }
0x1be7   :  { %v3334_v4 = vpop.f32.mrb[36].mxu0 }
0x1be8   :  { %3358 = vrot.lane.b32.xlu1 %v3334_v4, %s4504_s21  ;;  %v4218_v5 = vpop.f32.mrb[37].mxu0 }
0x1be9   :  { %v3495_v5 = vrot.slane %v4919_v17, %v1707_v7  ;;  %v3506_v7 = vrot.slane %v4919_v17, %v1717_v23 }
0x1c56   :  { %v3357_v43 = vpop.permute.xlu0 %3356 }
0x1c57   :  { %v3366_v18 = vsel %vm1578_vm8, %v3364_v14, %v3357_v43  ;;  %v3829_v43 = vld [vmem:[%s5186_s6 + $0x78] sm:$0xff]  ;;  %s4505_s6 = smov [#allocation2]  }
0x1c58   :  { %4227 = vmatprep.mubr.msk.f32.mxu1 %vm156_vm4, %v3366_v18  ;;  %v4360_v18 = vpack.c.bf16 %v3829_v43, %v3828_v6  ;;  %s3731_s26 = sshll.u32 %s4505_s6, 4  ;;  %s3732_s26 = int_to_ptr.vmem [resolvable:$true] %s3731_s26 }
0x1c59   :  { %s4464_s27 = scalar_lea.vmem %s3732_s26, 256  ;;  %p4469_p1 = scmp.lt.s32.totalorder %s3732_s26, %s3732_s26 }
0x1c5a   :  { %v3359_v26 = vpop.permute.xlu1 %3358  ;;  %p4465_p0 = scmp.ne.s32.totalorder %s3732_s26, %s4464_s27  ;;  %p4470_p2 = scmp.lt.s32.totalorder %s4464_s27, %s4464_s27 }
0x1c5b   :  { %v3367_v42 = vsel %vm1578_vm8, %v3365_v25, %v3359_v26 }
0x1c5c   :  { %4228 = vmatmul.mubr.msk.f32.vlgmr.msra.gmra.mrb[38].mxu1 %vm156_vm4, %v3367_v42  ;;  %p4471_p3 = por %p4470_p2, %p4469_p1 }
0x1c5d   :  { %4351 = vmatpush3.bf16.msra.mxu1 %v4348_v53 }
0x1c5e   :  { %4353 = vmatprep.subr.bf16.mxu1 %v4352_v55  ;;  %p4472_p4 = pnand %p4471_p3, %p4465_p0 }
0x1c61   :  { %4355 = vmatpush3.bf16.msra.mxu1 %v4352_v55 }
0x1c62   :  { %4357 = vmatprep.subr.bf16.mxu1 %v4356_v47 }
0x1c65   :  { %4359 = vmatpush3.bf16.msra.mxu1 %v4356_v47 }
0x1c66   :  { %4361 = vmatprep.subr.bf16.mxu1 %v4360_v18 }
0x1c69   :  { %4363 = vmatpush3.bf16.msra.mxu1 %v4360_v18 }
0x1d2f   :  { %v4229_v27 = vpop.f32.mrb[38].mxu1 }
0x1d30   :  { %v3455_v28 = vadd.f32 %v4229_v27, %v3376_v60  ;;  %v3449_v24 = vpop.f32.mrb[39].mxu1 }
0x1d31   :  { %v3450_v29 = vadd.f32 %v3449_v24, %v3376_v60 }
0x1d32   :  { %v3459_v30 = vadd.f32 %v3455_v28, %v4908_v16  ;;  %v3602_v28 = vrot.slane %v4919_v17, %v1812_v31 }
0x1d33   :  { %v3458_v32 = vadd.f32 %v3450_v29, %v4906_v15  ;;  %v3816_v15 = vld [vmem:[%s5185_s5 + $0x20] sm:$0xff] }
0x1d34   :  { %v3463_v62 = vsel %vm156_vm4, %v3459_v30, 0.0  ;;  %v4340_v51 = vpack.c.bf16 %v3817_v50, %v3816_v15 }
0x1d35   :  { %3464 = vadd.xlane.f32.xlu1 %v3463_v62  ;;  %v3460_v33 = vsel %vm156_vm4, %v3458_v32, 0.0 }
0x1d36   :  { %3461 = vadd.xlane.f32.xlu0 %v3460_v33  ;;  %4341 = vmatprep.subr.bf16.mxu0 %v4340_v51 }
0x1d37   :  { %4343 = vmatpush3.bf16.msra.mxu0 %v4340_v51 }
0x1d38   :  { %4345 = vmatprep.subr.bf16.mxu0 %v4344_v21 }
0x1d3b   :  { %4347 = vmatpush3.bf16.msra.mxu0 %v4344_v21 }
0x1dc2   :  { %v3465_v34 = vpop.xlane.xlu1 %3464 }
0x1dc3   :  { %v3467_v35 = vmul.f32 0.03125, %v3465_v34  ;;  %v3462_v36 = vpop.xlane.xlu0 %3461 }
0x1dc4   :  { %v3466_v37 = vmul.f32 0.03125, %v3462_v36 }
0x1dc5   :  { %v3469_v11 = vsub.f32 %v3459_v30, %v3467_v35 }
0x1dc6   :  { %v3468_v22 = vsub.f32 %v3458_v32, %v3466_v37 }
0x1dc7   :  { %v3471_v46 = vmul.f32 %v3469_v11, %v3469_v11 }
0x1dc8   :  { %v3470_v38 = vmul.f32 %v3468_v22, %v3468_v22 }
0x1dc9   :  { %v3475_v16 = vsel %vm156_vm4, %v3471_v46, 0.0 }
0x1dca   :  { %v3472_v44 = vsel %vm156_vm4, %v3470_v38, 0.0 }
0x1dcb   :  { %3473 = vadd.xlane.f32.xlu0 %v3472_v44 }
0x1dcf   :  { %3476 = vadd.xlane.f32.xlu0 %v3475_v16 }
0x1e58   :  { %v3474_v19 = vpop.xlane.xlu0 %3473 }
0x1e59   :  { %v3478_v58 = vmul.f32 0.03125, %v3474_v19 }
0x1e5b   :  { %v3480_v59 = vadd.f32 1e-12, %v3478_v58 }
0x1e5c   :  { %v3477_v61 = vpop.xlane.xlu0 %3476 }
0x1e5d   :  { %4456 = vrsqrt.f32 %v3480_v59  ;;  %v3479_v63 = vmul.f32 0.03125, %v3477_v61 }
0x1e5f   :  { %v3481_v0 = vadd.f32 1e-12, %v3479_v63 }
0x1e61   :  { %4458 = vrsqrt.f32 %v3481_v0 }
0x1e67   :  { %v4457_v2 = vpop.eup %4456 }
0x1e68   :  { %v3484_v4 = vmul.f32 %v4457_v2, %v3468_v22 }
0x1e6a   :  { %v3490_v8 = vmul.f32 %v3489_v1, %v3484_v4 }
0x1e6b   :  { %v4459_v9 = vpop.eup %4458 }
0x1e6c   :  { %v3485_v10 = vmul.f32 %v4459_v9, %v3469_v11  ;;  %v3496_v12 = vadd.f32 %v3495_v5, %v3490_v8 }
0x1e6e   :  { %v3491_v13 = vmul.f32 %v3489_v1, %v3485_v10  ;;  %4238 = vmatprep.mubr.msk.f32.mxu0 %vm156_vm4, %v3496_v12 }
0x1e70   :  { %v3497_v14 = vadd.f32 %v3495_v5, %v3491_v13 }
0x1e72   :  { %4239 = vmatmul.mubr.msk.f32.vlgmr.msra.gmra.mrb[38].mxu0 %vm156_vm4, %v3497_v14 }
0x1f45   :  { %v4240_v20 = vpop.f32.mrb[38].mxu0 }
0x1f46   :  { %v3585_v25 = vadd.f32 %v4240_v20, %v3506_v7  ;;  %v3579_v26 = vpop.f32.mrb[39].mxu0 }
0x1f47   :  { %v3580_v42 = vadd.f32 %v3579_v26, %v3506_v7 }
0x1f48   :  { %v3589_v27 = vmax.f32 %v3585_v25, 0.0 }
0x1f49   :  { %v3588_v60 = vmax.f32 %v3580_v42, 0.0 }
0x1f4b   :  { %4257 = vmatprep.mubr.msk.f32.mxu1 %vm1814_vm9, %v3588_v60 }
0x1f4c   :  { %4258 = vmatmul.mubr.msk.f32.vlgmr.msra.gmra.mrb[40].mxu1 %vm1814_vm9, %v3589_v27 }
0x201f   :  { %v4259_v24 = vpop.f32.mrb[40].mxu1 }
0x2020   :  { %v3681_v29 = vadd.f32 %v4259_v24, %v3602_v28  ;;  %v3675_v30 = vpop.f32.mrb[41].mxu1 }
0x2021   :  { %v3676_v32 = vadd.f32 %v3675_v30, %v3602_v28 }
0x2022   :  { %v3685_v62 = vadd.f32 %v3681_v29, %v3497_v14 }
0x2023   :  { %v3684_v23 = vadd.f32 %v3676_v32, %v3496_v12 }
0x2024   :  { %v3689_v33 = vsel %vm156_vm4, %v3685_v62, 0.0 }
0x2025   :  { %3690 = vadd.xlane.f32.xlu0 %v3689_v33  ;;  %v3686_v34 = vsel %vm156_vm4, %v3684_v23, 0.0 }
0x2026   :  { %3687 = vadd.xlane.f32.xlu1 %v3686_v34 }
0x20b2   :  { %v3691_v35 = vpop.xlane.xlu0 %3690 }
0x20b3   :  { %v3693_v36 = vmul.f32 0.03125, %v3691_v35  ;;  %v3688_v37 = vpop.xlane.xlu1 %3687 }
0x20b4   :  { %v3692_v11 = vmul.f32 0.03125, %v3688_v37 }
0x20b5   :  { %v3695_v22 = vsub.f32 %v3685_v62, %v3693_v36 }
0x20b6   :  { %v3694_v38 = vsub.f32 %v3684_v23, %v3692_v11 }
0x20b7   :  { %v3697_v44 = vmul.f32 %v3695_v22, %v3695_v22 }
0x20b8   :  { %v3696_v31 = vmul.f32 %v3694_v38, %v3694_v38 }
0x20b9   :  { %v3701_v46 = vsel %vm156_vm4, %v3697_v44, 0.0 }
0x20ba   :  { %3702 = vadd.xlane.f32.xlu0 %v3701_v46  ;;  %v3698_v16 = vsel %vm156_vm4, %v3696_v31, 0.0 }
0x20bb   :  { %3699 = vadd.xlane.f32.xlu1 %v3698_v16 }
0x2147   :  { %v3703_v15 = vpop.xlane.xlu0 %3702 }
0x2148   :  { %v3705_v50 = vmul.f32 0.03125, %v3703_v15  ;;  %v3700_v51 = vpop.xlane.xlu1 %3699 }
0x2149   :  { %v3704_v40 = vmul.f32 0.03125, %v3700_v51 }
0x214a   :  { %v3707_v39 = vadd.f32 1e-12, %v3705_v50 }
0x214b   :  { %v3706_v21 = vadd.f32 1e-12, %v3704_v40 }
0x214c   :  { %4460 = vrsqrt.f32 %v3707_v39 }
0x214d   :  { %4462 = vrsqrt.f32 %v3706_v21 }
0x2156   :  { %v4461_v49 = vpop.eup %4460 }
0x2157   :  { %v4463_v52 = vpop.eup %4462  ;;  %v3711_v53 = vmul.f32 %v4461_v49, %v3695_v22 }
0x2158   :  { %v3710_v55 = vmul.f32 %v4463_v52, %v3694_v38 }
0x2159   :  { %v3717_v56 = vmul.f32 %v3715_v45, %v3711_v53 }
0x215a   :  { %v3716_v57 = vmul.f32 %v3715_v45, %v3710_v55 }
0x215b   :  { %v3723_v47 = vadd.f32 %v3721_v54, %v3717_v56 }
0x215c   :  { %v3722_v19 = vadd.f32 %v3721_v54, %v3716_v57 }
0x215d   :  { %3725 = vst.msk [vmem:[#allocation2 + $0x8] sm:$0xff] %vm156_vm4, %v3723_v47 }
0x215e   :  { %3724 = vst.msk [vmem:[#allocation2] sm:$0xff] %vm156_vm4, %v3722_v19 }
0x215f   :  { %4475 = shalt.err (!%p4472_p4)
}
0x2160   :  { %s4476_s4 = scalar_lea.hbm %s5188_s8, 256 }
0x2161   :  { %p4477_p5 = scmp.ne.s32.totalorder %s5188_s8, %s4476_s4  ;;  %p4480_p6 = scmp.lt.u32.totalorder %s4476_s4, %s5188_s8 }
0x2163   :  { %p4482_p7 = pnand %p4480_p6, %p4477_p5 }
0x2165   :  { %4485 = shalt.err (!%p4482_p7)
}
0x2166   :  { %s4506_s13 = smov 128  }
0x2167   :  { %3737 = dma.vmem_to_hbm [thread:$0]  %s3732_s26, 256, %s5188_s8, [#allocation3], %s4506_s13, %s4506_s13, %s4502_s12  }
0x2168   :  { %4486 = dma.done.wait [#allocation3], 256  }
0x2169   :  { %4487 = vsyncadd [#allocation3], 4294967040 }
0x216a   :  { %3741 = vsyncpa [#allocation3], 1 }

</bundles_post_ra>
